<compile_context>
chip_gen: v7x
topology: tpu7x:2x2x1
jax: 0.10.0
libtpu: 0.0.40
codegen_flags: <defaults>
</compile_context>

<pallas_src>
import math
import jax
import jax.numpy as jnp
from jax.experimental import pallas as pl
from jax.experimental.pallas import tpu as pltpu

_EPS = 1e-5  # nn.BatchNorm2d default eps


def _default_vmem_limit():
    try:
        cap = pltpu.get_tpu_info().vmem_capacity_bytes
        return min(int(cap) * 3 // 4, 96 * 1024 * 1024)
    except Exception:
        return 48 * 1024 * 1024  # safe on v5e/v6e (128 MiB) and v7x (64 MiB)


_VMEM_LIMIT = _default_vmem_limit()


def _cparams(dimension_semantics):
    return pltpu.CompilerParams(dimension_semantics=dimension_semantics,
                                vmem_limit_bytes=_VMEM_LIMIT)


def _pick_tile(dim, candidates):
    # TODO(synk): pad non-conforming dims instead of falling back to one block.
    for c in candidates:
        if dim >= c and dim % c == 0:
            return c
    return dim


def _bn_row_tile(M, C, n_row_operands):
    budget = max(_VMEM_LIMIT // 4, 4 * 1024 * 1024)
    cands = tuple(c for c in (1024, 512, 256, 128, 64, 32, 16, 8)
                  if 2 * c * C * 4 * n_row_operands <= budget)
    return _pick_tile(M, cands if cands else (8,))


def _pick_row_chunk(Ho, Wo, Cout):
    budget = 256 * 1024  # bound the live f32 accumulator per chunk
    for d in range(Ho, 0, -1):
        if Ho % d == 0 and d * Wo * Cout * 4 <= budget:
            return d
    return 1


# ----------------------------------------------------------------------------
# 1x1 conv as tiled MXU matmul + fused per-tile BN-statistics epilogue.
#   y[M, Cout] = x[M, K] @ w[K, Cout]   (bf16 operands, f32 VMEM accumulator)
#   partial_stats[i, 0, :] = sum_m y_tile[m, :]
#   partial_stats[i, 1, :] = sum_m y_tile[m, :]**2
# Grid = (Cout tiles, M tiles, K tiles); the two leading axes are fully
# parallel (each (i, j) writes its own y tile and its own stats slab).
# ----------------------------------------------------------------------------
def _make_conv1x1_kernel(nk):
    def kernel(x_ref, w_ref, y_ref, stats_ref, acc_ref):
        k = pl.program_id(2)          # hoisted: never called inside pl.when
        is_first = k == 0
        is_last = k == nk - 1

        @pl.when(is_first)
        def _init():
            acc_ref[...] = jnp.zeros_like(acc_ref)

        acc_ref[...] += jnp.dot(x_ref[...], w_ref[...],
                                preferred_element_type=jnp.float32)

        @pl.when(is_last)
        def _finalize():
            y = acc_ref[...]
            y_ref[...] = y.astype(y_ref.dtype)
            cs = jnp.sum(y, axis=0, keepdims=True)
            cq = jnp.sum(y * y, axis=0, keepdims=True)
            stats_ref[...] = jnp.concatenate([cs, cq], axis=0)

    return kernel


def conv1x1_stats(x2d, w):
    M, K = x2d.shape
    K2, Cout = w.shape
    assert K == K2
    tm = _pick_tile(M, (512, 256, 128, 64, 32, 16, 8))
    tn = _pick_tile(Cout, (256, 128))
    tk = _pick_tile(K, (512, 256, 128))
    nmt, nkt = M // tm, K // tk
    y, pstats = pl.pallas_call(
        _make_conv1x1_kernel(nkt),
        out_shape=(jax.ShapeDtypeStruct((M, Cout), jnp.bfloat16),
                   jax.ShapeDtypeStruct((nmt, 2, Cout), jnp.float32)),
        grid=(Cout // tn, nmt, nkt),
        in_specs=[pl.BlockSpec((tm, tk), lambda j, i, k: (i, k)),
                  pl.BlockSpec((tk, tn), lambda j, i, k: (k, j))],
        out_specs=[pl.BlockSpec((tm, tn), lambda j, i, k: (i, j)),
                   pl.BlockSpec((None, 2, tn), lambda j, i, k: (i, 0, j))],
        scratch_shapes=[pltpu.VMEM((tm, tn), jnp.float32)],
        compiler_params=_cparams(("parallel", "parallel", "arbitrary")),
    )(x2d.astype(jnp.bfloat16), w.astype(jnp.bfloat16))
    stats = jnp.sum(pstats, axis=0)        # tiny (2, Cout) reduce outside
    return y, stats


# ----------------------------------------------------------------------------
# 3x3 conv (pad=1, stride s) without a materialized im2col.  Grid over
# samples; the padded sample lives in VMEM, the compute loops over output-row
# chunks so the live f32 accumulator stays small.  For Cin >= 64 the three
# taps of a kernel row are fused into one K=3*Cin matmul (MXU fill on
# v6e/v7x).  Per-sample partial BN stats keep the grid axis fully parallel.
# ----------------------------------------------------------------------------
def _make_conv3x3_kernel(Ho, Wo, Hp, Wp, stride, Cin, Cout, row_chunk,
                         fuse_row_taps):
    def kernel(xp_ref, w_ref, y_ref, stats_ref):
        xw = xp_ref[...]                                   # (Hp, Wp, Cin) bf16
        total_s = jnp.zeros((1, Cout), jnp.float32)
        total_q = jnp.zeros((1, Cout), jnp.float32)
        for hc in range(Ho // row_chunk):
            r0 = hc * row_chunk
            acc = jnp.zeros((row_chunk * Wo, Cout), jnp.float32)
            for di in range(3):
                lo = stride * r0 + di
                # TODO(synk): for stride=2 do space-to-depth in the wrapper to
                # avoid strided (relayout) slices inside the kernel.
                rows = jax.lax.slice(
                    xw, (lo, 0, 0),
                    (lo + (row_chunk - 1) * stride + 1, Wp, Cin),
                    (stride, 1, 1))                        # (rc, Wp, Cin)

                def col(dj, rows=rows):
                    return jax.lax.slice(
                        rows, (0, dj, 0),
                        (row_chunk, dj + (Wo - 1) * stride + 1, Cin),
                        (1, stride, 1))                    # (rc, Wo, Cin)

                if fuse_row_taps:
                    win = jnp.concatenate([col(dj) for dj in range(3)],
                                          axis=-1)          # (rc, Wo, 3*Cin)
                    acc = acc + jnp.dot(
                        win.reshape(row_chunk * Wo, 3 * Cin), w_ref[di],
                        preferred_element_type=jnp.float32)
                else:
                    for dj in range(3):
                        acc = acc + jnp.dot(
                            col(dj).reshape(row_chunk * Wo, Cin),
                            w_ref[di, dj * Cin:(dj + 1) * Cin, :],
                            preferred_element_type=jnp.float32)
            y_ref[r0 * Wo:(r0 + row_chunk) * Wo, :] = acc.astype(y_ref.dtype)
            total_s = total_s + jnp.sum(acc, axis=0, keepdims=True)
            total_q = total_q + jnp.sum(acc * acc, axis=0, keepdims=True)
        stats_ref[...] = jnp.concatenate([total_s, total_q], axis=0)

    return kernel


def conv3x3_stats(x_nhwc, w_hwio, stride):
    N, H, W, Cin = x_nhwc.shape
    Cout = w_hwio.shape[-1]
    Ho = (H + 2 - 3) // stride + 1
    Wo = (W + 2 - 3) // stride + 1
    Hp, Wp = H + 2, W + 2
    # TODO(synk): fold the halo into a row-tiled BlockSpec / manual DMA so the
    # padded tensor is never materialized and huge spatial extents never need
    # a full sample in one VMEM block.
    xp = jnp.pad(x_nhwc.astype(jnp.bfloat16), ((0, 0), (1, 1), (1, 1), (0, 0)))
    wt = w_hwio.reshape(3, 3 * Cin, Cout).astype(jnp.bfloat16)
    rc = _pick_row_chunk(Ho, Wo, Cout)
    fuse_row_taps = Cin >= 64
    y, pstats = pl.pallas_call(
        _make_conv3x3_kernel(Ho, Wo, Hp, Wp, stride, Cin, Cout, rc,
                             fuse_row_taps),
        out_shape=(jax.ShapeDtypeStruct((N, Ho * Wo, Cout), jnp.bfloat16),
                   jax.ShapeDtypeStruct((N, 2, Cout), jnp.float32)),
        grid=(N,),
        in_specs=[pl.BlockSpec((None, Hp, Wp, Cin), lambda n: (n, 0, 0, 0)),
                  pl.BlockSpec((3, 3 * Cin, Cout), lambda n: (0, 0, 0))],
        out_specs=[pl.BlockSpec((None, Ho * Wo, Cout), lambda n: (n, 0, 0)),
                   pl.BlockSpec((None, 2, Cout), lambda n: (n, 0, 0))],
        compiler_params=_cparams(("parallel",)),
    )(xp, wt)
    stats = jnp.sum(pstats, axis=0)        # tiny (2, Cout) reduce outside
    return y.reshape(N * Ho * Wo, Cout), stats, Ho, Wo


# ----------------------------------------------------------------------------
# BatchNorm apply kernels (training-mode batch statistics): normalize + affine,
# optional residual / second BN, ReLU, optional pre-activation output.
# Tiled over rows; stats / gamma / beta are tiny constant blocks.
# ----------------------------------------------------------------------------
def _make_bn_apply_kernel(m_total, mode):
    inv_m = 1.0 / float(m_total)

    def norm(y_ref, s_ref, g_ref, b_ref):
        y = y_ref[...].astype(jnp.float32)
        st = s_ref[...]
        mean = st[0:1, :] * inv_m
        var = jnp.maximum(st[1:2, :] * inv_m - mean * mean, 0.0)  # clamp >= 0
        scale = jax.lax.rsqrt(var + _EPS) * g_ref[...]
        return (y - mean) * scale + b_ref[...]

    if mode == "none":
        def kernel(y_ref, s_ref, g_ref, b_ref, o_ref):
            o_ref[...] = jnp.maximum(norm(y_ref, s_ref, g_ref, b_ref),
                                     0.0).astype(o_ref.dtype)
    elif mode == "identity":
        def kernel(y_ref, s_ref, g_ref, b_ref, r_ref, o_ref, p_ref):
            pre = (norm(y_ref, s_ref, g_ref, b_ref)
                   + r_ref[...].astype(jnp.float32))
            p_ref[...] = pre.astype(p_ref.dtype)
            o_ref[...] = jnp.maximum(pre, 0.0).astype(o_ref.dtype)
    elif mode == "bn":
        def kernel(y_ref, s_ref, g_ref, b_ref,
                   y2_ref, s2_ref, g2_ref, b2_ref, o_ref, p_ref):
            pre = (norm(y_ref, s_ref, g_ref, b_ref)
                   + norm(y2_ref, s2_ref, g2_ref, b2_ref))
            p_ref[...] = pre.astype(p_ref.dtype)
            o_ref[...] = jnp.maximum(pre, 0.0).astype(o_ref.dtype)
    else:
        raise ValueError(mode)
    return kernel


def _bn_specs(C, tm):
    row = pl.BlockSpec((tm, C), lambda i: (i, 0))
    stat = pl.BlockSpec((2, C), lambda i: (0, 0))
    chan = pl.BlockSpec((1, C), lambda i: (0, 0))
    return row, stat, chan


def bn_relu(y, stats, gamma, beta):
    M, C = y.shape
    tm = _bn_row_tile(M, C, 2)
    row, stat, chan = _bn_specs(C, tm)
    return pl.pallas_call(
        _make_bn_apply_kernel(M, "none"),
        out_shape=jax.ShapeDtypeStruct((M, C), jnp.bfloat16),
        grid=(M // tm,),
        in_specs=[row, stat, chan, chan],
        out_specs=row,
        compiler_params=_cparams(("parallel",)),
    )(y, stats, gamma.reshape(1, C), beta.reshape(1, C))


def bn_add_relu_identity(y, stats, gamma, beta, residual):
    M, C = y.shape
    tm = _bn_row_tile(M, C, 4)
    row, stat, chan = _bn_specs(C, tm)
    return pl.pallas_call(
        _make_bn_apply_kernel(M, "identity"),
        out_shape=(jax.ShapeDtypeStruct((M, C), jnp.float32),
                   jax.ShapeDtypeStruct((M, C), jnp.float32)),
        grid=(M // tm,),
        in_specs=[row, stat, chan, chan, row],
        out_specs=[row, row],
        compiler_params=_cparams(("parallel",)),
    )(y, stats, gamma.reshape(1, C), beta.reshape(1, C), residual)


def bn_add_relu_dual(y, stats, gamma, beta, y2, stats2, gamma2, beta2):
    M, C = y.shape
    tm = _bn_row_tile(M, C, 6)
    row, stat, chan = _bn_specs(C, tm)
    return pl.pallas_call(
        _make_bn_apply_kernel(M, "bn"),
        out_shape=(jax.ShapeDtypeStruct((M, C), jnp.float32),
                   jax.ShapeDtypeStruct((M, C), jnp.float32)),
        grid=(M // tm,),
        in_specs=[row, stat, chan, chan, row, stat, chan, chan],
        out_specs=[row, row],
        compiler_params=_cparams(("parallel",)),
    )(y, stats, gamma.reshape(1, C), beta.reshape(1, C),
      y2, stats2, gamma2.reshape(1, C), beta2.reshape(1, C))


# ----------------------------------------------------------------------------
# Bottleneck forward (matches the PyTorch module semantics, train()-mode BN).
# ----------------------------------------------------------------------------
def bottleneck_forward(x_nchw, p, is_last=False):
    stride = p['stride']
    x = jnp.transpose(x_nchw, (0, 2, 3, 1)).astype(jnp.bfloat16)  # NCHW->NHWC, cast once
    N, H, W, Cin = x.shape
    planes = p['w1'].shape[1]
    Cout = p['w3'].shape[1]                                        # expansion * planes

    # conv1 (1x1) -> BN1 -> ReLU
    y1, s1 = conv1x1_stats(x.reshape(N * H * W, Cin), p['w1'])
    h1 = bn_relu(y1, s1, p['g1'], p['b1'])                         # bf16

    # conv2 (3x3, stride, pad=1) -> BN2 -> ReLU
    y2, s2, Ho, Wo = conv3x3_stats(h1.reshape(N, H, W, planes), p['w2'], stride)
    h2 = bn_relu(y2, s2, p['g2'], p['b2'])                         # bf16

    # conv3 (1x1) -> BN3 (ReLU deferred until after the residual add)
    y3, s3 = conv1x1_stats(h2, p['w3'])

    M2 = N * Ho * Wo
    xs = x if stride == 1 else x[:, ::stride, ::stride, :]
    if 'ws' in p:                                                  # projection shortcut
        ysc, ssc = conv1x1_stats(xs.reshape(M2, Cin), p['ws'])
        out2d, pre2d = bn_add_relu_dual(y3, s3, p['g3'], p['b3'],
                                        ysc, ssc, p['gs'], p['bs'])
    else:                                                          # identity shortcut
        out2d, pre2d = bn_add_relu_identity(y3, s3, p['g3'], p['b3'],
                                            xs.reshape(M2, Cout))

    out = jnp.transpose(out2d.reshape(N, Ho, Wo, Cout), (0, 3, 1, 2))
    if is_last:
        pre = jnp.transpose(pre2d.reshape(N, Ho, Wo, Cout), (0, 3, 1, 2))
        return out, pre
    return out


# ----------------------------------------------------------------------------
# Deterministic parameter construction (shapes from the nn.Module __init__;
# 1x1 weights stored as (Cin, Cout), 3x3 weights as HWIO).
# TODO(synk): BatchNorm running_mean/running_var buffers are not updated; only
# the forward activations of a train()-mode module are reproduced.
# ----------------------------------------------------------------------------
def init_bottleneck_params(key, in_planes, planes, stride=1):
    expansion = 4
    out_planes = expansion * planes
    ks = jax.random.split(key, 4)

    def u(k, shape, fan_in):                   # PyTorch conv default scale
        bound = 1.0 / math.sqrt(fan_in)
        return jax.random.uniform(k, shape, jnp.float32, -bound, bound)

    p = {
        'stride': stride,
        'w1': u(ks[0], (in_planes, planes), in_planes),
        'g1': jnp.ones((planes,), jnp.float32),
        'b1': jnp.zeros((planes,), jnp.float32),
        'w2': u(ks[1], (3, 3, planes, planes), 9 * planes),
        'g2': jnp.ones((planes,), jnp.float32),
        'b2': jnp.zeros((planes,), jnp.float32),
        'w3': u(ks[2], (planes, out_planes), planes),
        'g3': jnp.ones((out_planes,), jnp.float32),
        'b3': jnp.zeros((out_planes,), jnp.float32),
    }
    if stride != 1 or in_planes != out_planes:
        p['ws'] = u(ks[3], (in_planes, out_planes), in_planes)
        p['gs'] = jnp.ones((out_planes,), jnp.float32)
        p['bs'] = jnp.zeros((out_planes,), jnp.float32)
    return p


# ----------------------------------------------------------------------------
if __name__ == "__main__":
    key = jax.random.PRNGKey(0)
    k_x, k_p1, k_p2 = jax.random.split(key, 3)

    batch, in_planes, planes, spatial = 2, 16, 8, 16
    x = jax.random.normal(k_x, (batch, in_planes, spatial, spatial), jnp.float32)

    # Block 1: projection shortcut (in_planes != 4*planes -> 1x1 conv + BN).
    p1 = init_bottleneck_params(k_p1, in_planes, planes, stride=1)
    # Block 2: identity shortcut; is_last=True also returns the pre-activation.
    p2 = init_bottleneck_params(k_p2, 4 * planes, planes, stride=1)

    out1 = bottleneck_forward(x, p1, is_last=False)
    out2, pre2 = bottleneck_forward(out1, p2, is_last=True)
    jax.block_until_ready((out1, out2, pre2))

    assert out1.shape == (batch, 4 * planes, spatial, spatial)
    assert out2.shape == (batch, 4 * planes, spatial, spatial)
    assert pre2.shape == (batch, 4 * planes, spatial, spatial)
    assert bool(jnp.all(jnp.isfinite(out2)))
    print("KERNEL_OK")
</pallas_src>

<mosaic_0001>
module attributes {stable_mosaic.version = 11 : i64} {
  func.func @kernel(%arg0: i32, %arg1: i32, %arg2: i32, %arg3: memref<512x16xbf16, #tpu.memory_space<vmem>>, %arg4: memref<16x8xbf16, #tpu.memory_space<vmem>>, %arg5: memref<512x8xbf16, #tpu.memory_space<vmem>>, %arg6: memref<1x2x8xf32, #tpu.memory_space<vmem>>, %arg7: memref<512x8xf32, #tpu.memory_space<vmem>>) attributes {dimension_semantics = [#tpu.dimension_semantics<parallel>, #tpu.dimension_semantics<parallel>, #tpu.dimension_semantics<arbitrary>], iteration_bounds = array<i64: 1, 1, 1>, scalar_prefetch = 0 : i64, scratch_operands = 1 : i64, tpu.core_type = #tpu.core_type<tc>, window_params = [{transform_indices = @transform_0, window_bounds = array<i64: 512, 16>}, {transform_indices = @transform_1, window_bounds = array<i64: 16, 8>}, {transform_indices = @transform_2, window_bounds = array<i64: 512, 8>}, {transform_indices = @transform_3, window_bounds = array<i64: 1, 2, 8>}]} {
    %c0_i32 = arith.constant 0 : i32
    %0 = arith.cmpi eq, %arg2, %c0_i32 : i32
    %c0_i32_0 = arith.constant 0 : i32
    %1 = arith.cmpi eq, %arg2, %c0_i32_0 : i32
    %2 = arith.extui %0 : i1 to i32
    %c0_i32_1 = arith.constant 0 : i32
    %3 = arith.cmpi ne, %2, %c0_i32_1 : i32
    scf.if %3 {
      %cst_10 = arith.constant 0.000000e+00 : f32
      %12 = vector.broadcast %cst_10 : f32 to vector<512x8xf32>
      %c0_11 = arith.constant 0 : index
      %c0_12 = arith.constant 0 : index
      %13 = vector.load %arg7[%c0_11, %c0_12] : memref<512x8xf32, #tpu.memory_space<vmem>>, vector<512x8xf32>
      tpu.vector_store %arg7[%c0_11, %c0_12], %12 {strides = array<i32>} : memref<512x8xf32, #tpu.memory_space<vmem>>, vector<512x8xf32>,
    } else {
    }
    %c0 = arith.constant 0 : index
    %c0_2 = arith.constant 0 : index
    %4 = vector.load %arg7[%c0, %c0_2] : memref<512x8xf32, #tpu.memory_space<vmem>>, vector<512x8xf32>
    %c0_3 = arith.constant 0 : index
    %c0_4 = arith.constant 0 : index
    %5 = vector.load %arg3[%c0_3, %c0_4] : memref<512x16xbf16, #tpu.memory_space<vmem>>, vector<512x16xbf16>
    %c0_5 = arith.constant 0 : index
    %c0_6 = arith.constant 0 : index
    %6 = vector.load %arg4[%c0_5, %c0_6] : memref<16x8xbf16, #tpu.memory_space<vmem>>, vector<16x8xbf16>
    %cst = arith.constant dense<0.000000e+00> : vector<512x8xf32>
    %7 = tpu.matmul %5, %6, %cst {dimension_numbers = #tpu.dot_dimension_numbers<[1], [0], [0], [1], [0, 0, 1, 1], [], []>} : vector<512x16xbf16>, vector<16x8xbf16>, vector<512x8xf32> -> vector<512x8xf32>
    %8 = arith.addf %4, %7 : vector<512x8xf32>
    %c0_7 = arith.constant 0 : index
    %c0_8 = arith.constant 0 : index
    %9 = vector.load %arg7[%c0_7, %c0_8] : memref<512x8xf32, #tpu.memory_space<vmem>>, vector<512x8xf32>
    tpu.vector_store %arg7[%c0_7, %c0_8], %8 {strides = array<i32>} : memref<512x8xf32, #tpu.memory_space<vmem>>, vector<512x8xf32>,
    %10 = arith.extui %1 : i1 to i32
    %c0_i32_9 = arith.constant 0 : i32
    %11 = arith.cmpi ne, %10, %c0_i32_9 : i32
    scf.if %11 {
      %c0_10 = arith.constant 0 : index
      %c0_11 = arith.constant 0 : index
      %12 = vector.load %arg7[%c0_10, %c0_11] : memref<512x8xf32, #tpu.memory_space<vmem>>, vector<512x8xf32>
      %13 = arith.truncf %12 : vector<512x8xf32> to vector<512x8xbf16>
      %c0_12 = arith.constant 0 : index
      %c0_13 = arith.constant 0 : index
      %14 = vector.load %arg5[%c0_12, %c0_13] : memref<512x8xbf16, #tpu.memory_space<vmem>>, vector<512x8xbf16>
      tpu.vector_store %arg5[%c0_12, %c0_13], %13 {strides = array<i32>} : memref<512x8xbf16, #tpu.memory_space<vmem>>, vector<512x8xbf16>,
      %cst_14 = arith.constant dense<0.000000e+00> : vector<8xf32>
      %15 = vector.multi_reduction <add>, %12, %cst_14 [0] : vector<512x8xf32> to vector<8xf32>
      %16 = vector.shape_cast %15 : vector<8xf32> to vector<1x8xf32>
      %17 = arith.mulf %12, %12 : vector<512x8xf32>
      %cst_15 = arith.constant dense<0.000000e+00> : vector<8xf32>
      %18 = vector.multi_reduction <add>, %17, %cst_15 [0] : vector<512x8xf32> to vector<8xf32>
      %19 = vector.shape_cast %18 : vector<8xf32> to vector<1x8xf32>
      %20 = tpu.concatenate %16, %19 in 0 : vector<1x8xf32>, vector<1x8xf32> -> vector<2x8xf32>
      %c0_16 = arith.constant 0 : index
      %c0_17 = arith.constant 0 : index
      %c0_18 = arith.constant 0 : index
      %21 = vector.load %arg6[%c0_16, %c0_17, %c0_18] : memref<1x2x8xf32, #tpu.memory_space<vmem>>, vector<1x2x8xf32>
      %22 = vector.shape_cast %21 : vector<1x2x8xf32> to vector<2x8xf32>
      %23 = vector.shape_cast %20 : vector<2x8xf32> to vector<1x2x8xf32>
      tpu.vector_store %arg6[%c0_16, %c0_17, %c0_18], %23 {strides = array<i32>} : memref<1x2x8xf32, #tpu.memory_space<vmem>>, vector<1x2x8xf32>,
    } else {
    }
    return
  }
  func.func @transform_0(%arg0: i32, %arg1: i32, %arg2: i32) -> (i32, i32) {
    %c0_i32 = arith.constant 0 : i32
    return %arg1, %arg2 : i32, i32
  }
  func.func @transform_1(%arg0: i32, %arg1: i32, %arg2: i32) -> (i32, i32) {
    %c0_i32 = arith.constant 0 : i32
    return %arg2, %arg0 : i32, i32
  }
  func.func @transform_2(%arg0: i32, %arg1: i32, %arg2: i32) -> (i32, i32) {
    %c0_i32 = arith.constant 0 : i32
    return %arg1, %arg0 : i32, i32
  }
  func.func @transform_3(%arg0: i32, %arg1: i32, %arg2: i32) -> (i32, i32, i32) {
    %c0_i32 = arith.constant 0 : i32
    %c0_i32_0 = arith.constant 0 : i32
    return %arg1, %c0_i32, %arg0 : i32, i32, i32
  }
}

</mosaic_0001>

<bundles_post_ra>
// kernel: tpu_custom_call.1
= control target key start
LH: loop header
LB: loop body
LE: loop exit
PB: predicated region body
PF: predicated region fallthrough
CT: control target
= control target key end

     0   :  { %vm380_vm0 = vcmask 130048   ;;  %vm19_vm1 = vcmask 64512   ;;  %v1988_v4 = vmov 0.0   ;;  %s3093_s0 = inlined_call_operand.vmem [shape: bf16[512,16], index: 0, kind: input, shape index: {}]   ;;  %s3094_s1 = inlined_call_operand.vmem [shape: bf16[16,8], index: 1, kind: input, shape index: {}]   ;;  %s3095_s2 = inlined_call_operand.vmem [shape: bf16[512,8], index: 2, kind: output, shape index: {0}]   ;;  %s3096_s3 = inlined_call_operand.hbm [shape: f32[1,2,8], index: 3, kind: output, shape index: {1}]  }
   0x1   :  { %v2013_v0 = vld [vmem:[%s3094_s1] sm:$0xff]   ;;  %v2022_v2 = vld [vmem:[%s3093_s0 + $0x8] sm:$0xff]   ;;  %v2030_v3 = vld [vmem:[%s3093_s0 + $0x10] sm:$0xff]   ;;  %22 = vst.msk [vmem:[#allocation2 + $0x10] sm:$0xff] %vm19_vm1, %v1988_v4 }
   0x2   :  { %v1932_v1 = vld [vmem:[%s3093_s0] sm:$0xff]   ;;  %1861 = vmatprep.subr.bf16.mxu0 %v2013_v0  ;;  %1927 = vmatprep.subr.bf16.mxu1 %v2013_v0  ;;  %20 = vst.msk [vmem:[#allocation2] sm:$0xff] %vm19_vm1, %v1988_v4  ;;  %21 = vst.msk [vmem:[#allocation2 + $0x8] sm:$0xff] %vm19_vm1, %v1988_v4  ;;  %v1935_v5 = vld [vmem:[%s3093_s0 + $0x18] sm:$0xff]  }
   0x3   :  { %1862 = vmatpush3.bf16.msra.mxu0 %v2013_v0  ;;  %1863 = vmatprep.mubr.msk.bf16.mxu0 %vm380_vm0, %v1932_v1  ;;  %23 = vst.msk [vmem:[#allocation2 + $0x18] sm:$0xff] %vm19_vm1, %v1988_v4  ;;  %24 = vst.msk [vmem:[#allocation2 + $0x20] sm:$0xff] %vm19_vm1, %v1988_v4  ;;  %v1936_v6 = vld [vmem:[%s3093_s0 + $0x20] sm:$0xff]   ;;  %v1937_v7 = vld [vmem:[%s3093_s0 + $0x28] sm:$0xff]  }
   0x4   :  { %25 = vst.msk [vmem:[#allocation2 + $0x28] sm:$0xff] %vm19_vm1, %v1988_v4  ;;  %26 = vst.msk [vmem:[#allocation2 + $0x30] sm:$0xff] %vm19_vm1, %v1988_v4  ;;  %1928 = vmatpush3.bf16.msra.mxu1 %v2013_v0  ;;  %v1938_v8 = vld [vmem:[%s3093_s0 + $0x30] sm:$0xff]   ;;  %v1948_v9 = vld [vmem:[%s3093_s0 + $0x80] sm:$0xff]  }
   0x5   :  { %27 = vst.msk [vmem:[#allocation2 + $0x38] sm:$0xff] %vm19_vm1, %v1988_v4  ;;  %28 = vst.msk [vmem:[#allocation2 + $0x40] sm:$0xff] %vm19_vm1, %v1988_v4  ;;  %v1949_v10 = vld [vmem:[%s3093_s0 + $0x88] sm:$0xff]   ;;  %1895 = vmatprep.mubr.msk.bf16.mxu1 %vm380_vm0, %v1948_v9  ;;  %v1950_v11 = vld [vmem:[%s3093_s0 + $0x90] sm:$0xff]  }
   0x6   :  { %29 = vst.msk [vmem:[#allocation2 + $0x48] sm:$0xff] %vm19_vm1, %v1988_v4  ;;  %30 = vst.msk [vmem:[#allocation2 + $0x50] sm:$0xff] %vm19_vm1, %v1988_v4  ;;  %1864 = vmatmul.mubr.msk.bf16.vlgmr.msra.gmra.mrb[0].mxu0 %vm380_vm0, %v2022_v2  ;;  %v1951_v12 = vld [vmem:[%s3093_s0 + $0x98] sm:$0xff]   ;;  %v1952_v13 = vld [vmem:[%s3093_s0 + $0xa0] sm:$0xff]  }
   0x7   :  { %31 = vst.msk [vmem:[#allocation2 + $0x58] sm:$0xff] %vm19_vm1, %v1988_v4  ;;  %32 = vst.msk [vmem:[#allocation2 + $0x60] sm:$0xff] %vm19_vm1, %v1988_v4  ;;  %1867 = vmatprep.mubr.msk.bf16.mxu0 %vm380_vm0, %v2030_v3  ;;  %1896 = vmatmul.mubr.msk.bf16.vlgmr.msra.gmra.mrb[0].mxu1 %vm380_vm0, %v1949_v10  ;;  %v1939_v14 = vld [vmem:[%s3093_s0 + $0x38] sm:$0xff]   ;;  %v1940_v15 = vld [vmem:[%s3093_s0 + $0x40] sm:$0xff]  }
   0x8   :  { %33 = vst.msk [vmem:[#allocation2 + $0x68] sm:$0xff] %vm19_vm1, %v1988_v4  ;;  %34 = vst.msk [vmem:[#allocation2 + $0x70] sm:$0xff] %vm19_vm1, %v1988_v4  ;;  %1899 = vmatprep.mubr.msk.bf16.mxu1 %vm380_vm0, %v1950_v11  ;;  %v1953_v16 = vld [vmem:[%s3093_s0 + $0xa8] sm:$0xff]   ;;  %v1954_v17 = vld [vmem:[%s3093_s0 + $0xb0] sm:$0xff]  }
   0x9   :  { %35 = vst.msk [vmem:[#allocation2 + $0x78] sm:$0xff] %vm19_vm1, %v1988_v4  ;;  %36 = vst.msk [vmem:[#allocation2 + $0x80] sm:$0xff] %vm19_vm1, %v1988_v4 }
   0xa   :  { %37 = vst.msk [vmem:[#allocation2 + $0x88] sm:$0xff] %vm19_vm1, %v1988_v4  ;;  %38 = vst.msk [vmem:[#allocation2 + $0x90] sm:$0xff] %vm19_vm1, %v1988_v4 }
   0xb   :  { %39 = vst.msk [vmem:[#allocation2 + $0x98] sm:$0xff] %vm19_vm1, %v1988_v4  ;;  %40 = vst.msk [vmem:[#allocation2 + $0xa0] sm:$0xff] %vm19_vm1, %v1988_v4 }
   0xc   :  { %41 = vst.msk [vmem:[#allocation2 + $0xa8] sm:$0xff] %vm19_vm1, %v1988_v4  ;;  %42 = vst.msk [vmem:[#allocation2 + $0xb0] sm:$0xff] %vm19_vm1, %v1988_v4 }
   0xd   :  { %43 = vst.msk [vmem:[#allocation2 + $0xb8] sm:$0xff] %vm19_vm1, %v1988_v4  ;;  %44 = vst.msk [vmem:[#allocation2 + $0xc0] sm:$0xff] %vm19_vm1, %v1988_v4 }
   0xe   :  { %45 = vst.msk [vmem:[#allocation2 + $0xc8] sm:$0xff] %vm19_vm1, %v1988_v4  ;;  %46 = vst.msk [vmem:[#allocation2 + $0xd0] sm:$0xff] %vm19_vm1, %v1988_v4  ;;  %1868 = vmatmul.mubr.msk.bf16.gmra.mrb[4].mxu0 %vm380_vm0, %v1935_v5 }
   0xf   :  { %47 = vst.msk [vmem:[#allocation2 + $0xd8] sm:$0xff] %vm19_vm1, %v1988_v4  ;;  %48 = vst.msk [vmem:[#allocation2 + $0xe0] sm:$0xff] %vm19_vm1, %v1988_v4  ;;  %1871 = vmatprep.mubr.msk.bf16.mxu0 %vm380_vm0, %v1936_v6  ;;  %1900 = vmatmul.mubr.msk.bf16.gmra.mrb[4].mxu1 %vm380_vm0, %v1951_v12 }
  0x10   :  { %49 = vst.msk [vmem:[#allocation2 + $0xe8] sm:$0xff] %vm19_vm1, %v1988_v4  ;;  %50 = vst.msk [vmem:[#allocation2 + $0xf0] sm:$0xff] %vm19_vm1, %v1988_v4  ;;  %1903 = vmatprep.mubr.msk.bf16.mxu1 %vm380_vm0, %v1952_v13 }
  0x11   :  { %51 = vst.msk [vmem:[#allocation2 + $0xf8] sm:$0xff] %vm19_vm1, %v1988_v4  ;;  %52 = vst.msk [vmem:[#allocation2 + $0x100] sm:$0xff] %vm19_vm1, %v1988_v4 }
  0x12   :  { %53 = vst.msk [vmem:[#allocation2 + $0x108] sm:$0xff] %vm19_vm1, %v1988_v4  ;;  %54 = vst.msk [vmem:[#allocation2 + $0x110] sm:$0xff] %vm19_vm1, %v1988_v4 }
  0x13   :  { %55 = vst.msk [vmem:[#allocation2 + $0x118] sm:$0xff] %vm19_vm1, %v1988_v4  ;;  %56 = vst.msk [vmem:[#allocation2 + $0x120] sm:$0xff] %vm19_vm1, %v1988_v4 }
  0x14   :  { %57 = vst.msk [vmem:[#allocation2 + $0x128] sm:$0xff] %vm19_vm1, %v1988_v4  ;;  %58 = vst.msk [vmem:[#allocation2 + $0x130] sm:$0xff] %vm19_vm1, %v1988_v4 }
  0x15   :  { %59 = vst.msk [vmem:[#allocation2 + $0x138] sm:$0xff] %vm19_vm1, %v1988_v4  ;;  %60 = vst.msk [vmem:[#allocation2 + $0x140] sm:$0xff] %vm19_vm1, %v1988_v4 }
  0x16   :  { %61 = vst.msk [vmem:[#allocation2 + $0x148] sm:$0xff] %vm19_vm1, %v1988_v4  ;;  %62 = vst.msk [vmem:[#allocation2 + $0x150] sm:$0xff] %vm19_vm1, %v1988_v4  ;;  %1872 = vmatmul.mubr.msk.bf16.gmra.mrb[8].mxu0 %vm380_vm0, %v1937_v7 }
  0x17   :  { %63 = vst.msk [vmem:[#allocation2 + $0x158] sm:$0xff] %vm19_vm1, %v1988_v4  ;;  %64 = vst.msk [vmem:[#allocation2 + $0x160] sm:$0xff] %vm19_vm1, %v1988_v4  ;;  %1875 = vmatprep.mubr.msk.bf16.mxu0 %vm380_vm0, %v1938_v8 }
  0x18   :  { %65 = vst.msk [vmem:[#allocation2 + $0x168] sm:$0xff] %vm19_vm1, %v1988_v4  ;;  %66 = vst.msk [vmem:[#allocation2 + $0x170] sm:$0xff] %vm19_vm1, %v1988_v4 }
  0x19   :  { %67 = vst.msk [vmem:[#allocation2 + $0x178] sm:$0xff] %vm19_vm1, %v1988_v4  ;;  %68 = vst.msk [vmem:[#allocation2 + $0x180] sm:$0xff] %vm19_vm1, %v1988_v4 }
  0x1a   :  { %69 = vst.msk [vmem:[#allocation2 + $0x188] sm:$0xff] %vm19_vm1, %v1988_v4  ;;  %70 = vst.msk [vmem:[#allocation2 + $0x190] sm:$0xff] %vm19_vm1, %v1988_v4 }
  0x1b   :  { %71 = vst.msk [vmem:[#allocation2 + $0x198] sm:$0xff] %vm19_vm1, %v1988_v4  ;;  %72 = vst.msk [vmem:[#allocation2 + $0x1a0] sm:$0xff] %vm19_vm1, %v1988_v4 }
  0x1c   :  { %73 = vst.msk [vmem:[#allocation2 + $0x1a8] sm:$0xff] %vm19_vm1, %v1988_v4  ;;  %74 = vst.msk [vmem:[#allocation2 + $0x1b0] sm:$0xff] %vm19_vm1, %v1988_v4 }
  0x1d   :  { %75 = vst.msk [vmem:[#allocation2 + $0x1b8] sm:$0xff] %vm19_vm1, %v1988_v4  ;;  %76 = vst.msk [vmem:[#allocation2 + $0x1c0] sm:$0xff] %vm19_vm1, %v1988_v4 }
  0x1e   :  { %77 = vst.msk [vmem:[#allocation2 + $0x1c8] sm:$0xff] %vm19_vm1, %v1988_v4  ;;  %78 = vst.msk [vmem:[#allocation2 + $0x1d0] sm:$0xff] %vm19_vm1, %v1988_v4  ;;  %1876 = vmatmul.mubr.msk.bf16.gmra.mrb[12].mxu0 %vm380_vm0, %v1939_v14 }
  0x1f   :  { %79 = vst.msk [vmem:[#allocation2 + $0x1d8] sm:$0xff] %vm19_vm1, %v1988_v4  ;;  %80 = vst.msk [vmem:[#allocation2 + $0x1e0] sm:$0xff] %vm19_vm1, %v1988_v4  ;;  %1879 = vmatprep.mubr.msk.bf16.mxu0 %vm380_vm0, %v1940_v15 }
  0x20   :  { %81 = vst.msk [vmem:[#allocation2 + $0x1e8] sm:$0xff] %vm19_vm1, %v1988_v4  ;;  %82 = vst.msk [vmem:[#allocation2 + $0x1f0] sm:$0xff] %vm19_vm1, %v1988_v4 }
  0x21   :  { %83 = vst.msk [vmem:[#allocation2 + $0x1f8] sm:$0xff] %vm19_vm1, %v1988_v4 }
  0x22   :  { %9 = vsyncpa [#allocation4], 0  ;;  %v1941_v18 = vld [vmem:[%s3093_s0 + $0x48] sm:$0xff]   ;;  %v1942_v19 = vld [vmem:[%s3093_s0 + $0x50] sm:$0xff]   ;;  %1904 = vmatmul.mubr.msk.bf16.gmra.mrb[8].mxu1 %vm380_vm0, %v1953_v16  ;;  %vm1218_vm2 = vcmask 60416   ;;  %vm1613_vm3 = vcmask 1040384  }
  0x23   :  { %1907 = vmatprep.mubr.msk.bf16.mxu1 %vm380_vm0, %v1954_v17  ;;  %v1955_v20 = vld [vmem:[%s3093_s0 + $0xb8] sm:$0xff]   ;;  %v1956_v21 = vld [vmem:[%s3093_s0 + $0xc0] sm:$0xff]   ;;  %v1957_v24 = vld [vmem:[%s3093_s0 + $0xc8] sm:$0xff]   ;;  %vm1615_vm4 = vcmask 58368  }
  0x24   :  { %v1943_v22 = vld [vmem:[%s3093_s0 + $0x58] sm:$0xff]   ;;  %v1944_v23 = vld [vmem:[%s3093_s0 + $0x60] sm:$0xff]   ;;  %v1958_v25 = vld [vmem:[%s3093_s0 + $0xd0] sm:$0xff]  }
  0x25   :  { %v1945_v26 = vld [vmem:[%s3093_s0 + $0x68] sm:$0xff]   ;;  %v1946_v27 = vld [vmem:[%s3093_s0 + $0x70] sm:$0xff]   ;;  %v1959_v28 = vld [vmem:[%s3093_s0 + $0xd8] sm:$0xff]  }
  0x26   :  { %1880 = vmatmul.mubr.msk.bf16.gmra.mrb[16].mxu0 %vm380_vm0, %v1941_v18  ;;  %v1960_v29 = vld [vmem:[%s3093_s0 + $0xe0] sm:$0xff]   ;;  %v1947_v30 = vld [vmem:[%s3093_s0 + $0x78] sm:$0xff]   ;;  %v1961_v31 = vld [vmem:[%s3093_s0 + $0xe8] sm:$0xff]  }
  0x27   :  { %1883 = vmatprep.mubr.msk.bf16.mxu0 %vm380_vm0, %v1942_v19  ;;  %v1962_v32 = vld [vmem:[%s3093_s0 + $0xf0] sm:$0xff]   ;;  %v1963_v33 = vld [vmem:[%s3093_s0 + $0xf8] sm:$0xff]   ;;  %v84_v35 = vld [vmem:[#allocation2] sm:$0xff] }
  0x28   :  { %v86_v34 = vld [vmem:[#allocation2 + $0x10] sm:$0xff]  ;;  %v87_v37 = vld [vmem:[#allocation2 + $0x18] sm:$0xff]  ;;  %v85_v40 = vld [vmem:[#allocation2 + $0x8] sm:$0xff] }
  0x29   :  { %v90_v46 = vld [vmem:[#allocation2 + $0x30] sm:$0xff]  ;;  %v88_v47 = vld [vmem:[#allocation2 + $0x20] sm:$0xff]  ;;  %v91_v49 = vld [vmem:[#allocation2 + $0x38] sm:$0xff] }
  0x2a   :  { %1908 = vmatmul.mubr.msk.bf16.gmra.mrb[12].mxu1 %vm380_vm0, %v1955_v20  ;;  %v89_v52 = vld [vmem:[#allocation2 + $0x28] sm:$0xff]  ;;  %v118_v0 = vld [vmem:[#allocation2 + $0x110] sm:$0xff]  ;;  %v116_v4 = vld [vmem:[#allocation2 + $0x100] sm:$0xff] }
  0x2b   :  { %1911 = vmatprep.mubr.msk.bf16.mxu1 %vm380_vm0, %v1956_v21  ;;  %v94_v9 = vld [vmem:[#allocation2 + $0x50] sm:$0xff]  ;;  %v119_v11 = vld [vmem:[#allocation2 + $0x118] sm:$0xff]  ;;  %v92_v14 = vld [vmem:[#allocation2 + $0x40] sm:$0xff] }
  0x2c   :  { %v117_v17 = vld [vmem:[#allocation2 + $0x108] sm:$0xff] }
  0x2e   :  { %1884 = vmatmul.mubr.msk.bf16.gmra.mrb[20].mxu0 %vm380_vm0, %v1943_v22 }
  0x2f   :  { %1887 = vmatprep.mubr.msk.bf16.mxu0 %vm380_vm0, %v1944_v23 }
  0x32   :  { %1912 = vmatmul.mubr.msk.bf16.gmra.mrb[16].mxu1 %vm380_vm0, %v1957_v24 }
  0x33   :  { %1915 = vmatprep.mubr.msk.bf16.mxu1 %vm380_vm0, %v1958_v25 }
  0x36   :  { %1888 = vmatmul.mubr.msk.bf16.gmra.mrb[24].mxu0 %vm380_vm0, %v1945_v26 }
  0x37   :  { %1891 = vmatprep.mubr.msk.bf16.mxu0 %vm380_vm0, %v1946_v27 }
  0x3a   :  { %1916 = vmatmul.mubr.msk.bf16.gmra.mrb[20].mxu1 %vm380_vm0, %v1959_v28 }
  0x3b   :  { %1919 = vmatprep.mubr.msk.bf16.mxu1 %vm380_vm0, %v1960_v29 }
  0x3e   :  { %1892 = vmatmul.mubr.msk.bf16.gmra.mrb[28].mxu0 %vm380_vm0, %v1947_v30 }
  0x42   :  { %1920 = vmatmul.mubr.msk.bf16.gmra.mrb[24].mxu1 %vm380_vm0, %v1961_v31 }
  0x43   :  { %1923 = vmatprep.mubr.msk.bf16.mxu1 %vm380_vm0, %v1962_v32 }
  0x4a   :  { %1924 = vmatmul.mubr.msk.bf16.gmra.mrb[28].mxu1 %vm380_vm0, %v1963_v33 }
  0xd9   :  { %v1865_v36 = vpop.f32.mrb[0].mxu0 }
  0xda   :  { %v768_v38 = vadd.f32 %v1865_v36, %v86_v34  ;;  %v511_v39 = vpop.f32.mrb[1].mxu0  ;;  %v1897_v10 = vpop.f32.mrb[0].mxu1 }
  0xdb   :  { %v766_v41 = vadd.f32 %v511_v39, %v84_v35  ;;  %v1866_v42 = vpop.f32.mrb[2].mxu0  ;;  %v800_v15 = vadd.f32 %v1897_v10, %v118_v0  ;;  %v639_v16 = vpop.f32.mrb[1].mxu1 }
  0xdc   :  { %833 = vst.msk [vmem:[#allocation2 + $0x10] sm:$0xff] %vm19_vm1, %v768_v38  ;;  %v769_v43 = vadd.f32 %v1866_v42, %v87_v37  ;;  %v514_v44 = vpop.f32.mrb[3].mxu0  ;;  %v798_v22 = vadd.f32 %v639_v16, %v116_v4  ;;  %v1898_v23 = vpop.f32.mrb[2].mxu1  ;;  %v99_v4 = vld [vmem:[#allocation2 + $0x78] sm:$0xff] }
  0xdd   :  { %831 = vst.msk [vmem:[#allocation2] sm:$0xff] %vm19_vm1, %v766_v41  ;;  %v767_v45 = vadd.f32 %v514_v44, %v85_v40  ;;  %865 = vst.msk [vmem:[#allocation2 + $0x110] sm:$0xff] %vm19_vm1, %v800_v15  ;;  %v801_v28 = vadd.f32 %v1898_v23, %v119_v11  ;;  %v642_v29 = vpop.f32.mrb[3].mxu1 }
  0xde   :  { %834 = vst.msk [vmem:[#allocation2 + $0x18] sm:$0xff] %vm19_vm1, %v769_v43  ;;  %863 = vst.msk [vmem:[#allocation2 + $0x100] sm:$0xff] %vm19_vm1, %v798_v22  ;;  %v799_v34 = vadd.f32 %v642_v29, %v117_v17 }
  0xdf   :  { %832 = vst.msk [vmem:[#allocation2 + $0x8] sm:$0xff] %vm19_vm1, %v767_v45  ;;  %866 = vst.msk [vmem:[#allocation2 + $0x118] sm:$0xff] %vm19_vm1, %v801_v28 }
  0xe0   :  { %864 = vst.msk [vmem:[#allocation2 + $0x108] sm:$0xff] %vm19_vm1, %v799_v34 }
  0xe1   :  { %v1869_v48 = vpop.f32.mrb[4].mxu0 }
  0xe2   :  { %v772_v50 = vadd.f32 %v1869_v48, %v90_v46  ;;  %v527_v51 = vpop.f32.mrb[5].mxu0  ;;  %v95_v46 = vld [vmem:[#allocation2 + $0x58] sm:$0xff] }
  0xe3   :  { %v900_v53 = vld [vmem:[#allocation2 + $0x10] sm:$0xff]  ;;  %v770_v54 = vadd.f32 %v527_v51, %v88_v47  ;;  %v1870_v55 = vpop.f32.mrb[6].mxu0 }
  0xe4   :  { %v1766_v56 = vpack.c.bf16 %v900_v53, %v900_v53  ;;  %v898_v57 = vld [vmem:[#allocation2] sm:$0xff]  ;;  %837 = vst.msk [vmem:[#allocation2 + $0x30] sm:$0xff] %vm19_vm1, %v772_v50  ;;  %v773_v58 = vadd.f32 %v1870_v55, %v91_v49  ;;  %v530_v59 = vpop.f32.mrb[7].mxu0  ;;  %v1418_v1 = vmul.f32 %v900_v53, %v900_v53  ;;  %v1286_v18 = vsel %vm19_vm1, %v900_v53, 0.0  ;;  %v93_v50 = vld [vmem:[#allocation2 + $0x48] sm:$0xff]  ;;  %v122_v51 = vld [vmem:[#allocation2 + $0x130] sm:$0xff] }
  0xe5   :  { %v1764_v60 = vpack.c.bf16 %v898_v57, %v898_v57  ;;  %v1416_v61 = vmul.f32 %v898_v57, %v898_v57  ;;  %v901_v62 = vld [vmem:[#allocation2 + $0x18] sm:$0xff]  ;;  %835 = vst.msk [vmem:[#allocation2 + $0x20] sm:$0xff] %vm19_vm1, %v770_v54  ;;  %v771_v63 = vadd.f32 %v530_v59, %v89_v52  ;;  %v1283_v5 = vsel %vm19_vm1, %v898_v57, 0.0  ;;  %v1901_v57 = vpop.f32.mrb[4].mxu1 }
  0xe6   :  { %1221 = vst.msk [vmem:[%s3095_s2 + $0x8] sm:$0xf] %vm1218_vm2, %v1766_v56  ;;  %v1767_v2 = vpack.c.bf16 %v901_v62, %v901_v62  ;;  %v899_v3 = vld [vmem:[#allocation2 + $0x8] sm:$0xff]  ;;  %v1419_v12 = vmul.f32 %v901_v62, %v901_v62  ;;  %v1483_v30 = vsel %vm19_vm1, %v1418_v1, 0.0  ;;  %v1288_v35 = vsel %vm19_vm1, %v901_v62, 0.0  ;;  %v98_v56 = vld [vmem:[#allocation2 + $0x70] sm:$0xff] }
  0xe7   :  { %838 = vst.msk [vmem:[#allocation2 + $0x38] sm:$0xff] %vm19_vm1, %v773_v58  ;;  %v1765_v6 = vpack.c.bf16 %v899_v3, %v899_v3  ;;  %v1284_v7 = vsel %vm19_vm1, %v899_v3, 0.0  ;;  %v1417_v8 = vmul.f32 %v899_v3, %v899_v3  ;;  %836 = vst.msk [vmem:[#allocation2 + $0x28] sm:$0xff] %vm19_vm1, %v771_v63  ;;  %v1480_v19 = vsel %vm19_vm1, %v1416_v61, 0.0  ;;  %v96_v62 = vld [vmem:[#allocation2 + $0x60] sm:$0xff]  ;;  %v2334_v63 = vpop.f32.mrb[5].mxu1 }
  0xe8   :  { %1219 = vst.msk [vmem:[%s3095_s2] sm:$0xf] %vm1218_vm2, %v1764_v60  ;;  %1222 = vst.msk [vmem:[%s3095_s2 + $0xc] sm:$0xf] %vm1218_vm2, %v1767_v2  ;;  %v1285_v13 = vadd.f32 %v1284_v7, %v1283_v5  ;;  %v1485_v36 = vsel %vm19_vm1, %v1419_v12, 0.0  ;;  %v2341_v5 = vld [vmem:[#allocation2 + $0x110] sm:$0xff] }
  0xe9   :  { %1220 = vst.msk [vmem:[%s3095_s2 + $0x4] sm:$0xf] %vm1218_vm2, %v1765_v6  ;;  %v1481_v20 = vsel %vm19_vm1, %v1417_v8, 0.0  ;;  %v1873_v21 = vpop.f32.mrb[8].mxu0  ;;  %v804_v6 = vadd.f32 %v1901_v57, %v122_v51  ;;  %v2343_v7 = vpop.f32.mrb[6].mxu1  ;;  %v1798_v12 = vpack.c.bf16 %v2341_v5, %v2341_v5 }
  0xea   :  { %v1287_v24 = vadd.f32 %v1286_v18, %v1285_v13  ;;  %v1482_v25 = vadd.f32 %v1481_v20, %v1480_v19  ;;  %v776_v26 = vadd.f32 %v1873_v21, %v94_v9  ;;  %v543_v27 = vpop.f32.mrb[9].mxu0  ;;  %v2349_v13 = vpop.f32.mrb[7].mxu1  ;;  %v97_v19 = vld [vmem:[#allocation2 + $0x68] sm:$0xff] }
  0xeb   :  { %v904_v31 = vld [vmem:[#allocation2 + $0x30] sm:$0xff]  ;;  %v774_v32 = vadd.f32 %v543_v27, %v92_v14  ;;  %v1874_v33 = vpop.f32.mrb[10].mxu0  ;;  %869 = vst.msk [vmem:[#allocation2 + $0x130] sm:$0xff] %vm19_vm1, %v804_v6 }
  0xec   :  { %v1484_v37 = vadd.f32 %v1483_v30, %v1482_v25  ;;  %v1770_v38 = vpack.c.bf16 %v904_v31, %v904_v31  ;;  %v902_v39 = vld [vmem:[#allocation2 + $0x20] sm:$0xff]  ;;  %841 = vst.msk [vmem:[#allocation2 + $0x50] sm:$0xff] %vm19_vm1, %v776_v26  ;;  %v546_v40 = vpop.f32.mrb[11].mxu0  ;;  %v1289_v42 = vadd.f32 %v1288_v35, %v1287_v24  ;;  %v1422_v52 = vmul.f32 %v904_v31, %v904_v31  ;;  %v2376_v35 = vld [vmem:[#allocation2 + $0x108] sm:$0xff] }
  0xed   :  { %v1768_v41 = vpack.c.bf16 %v902_v39, %v902_v39  ;;  %v1290_v43 = vsel %vm19_vm1, %v902_v39, 0.0  ;;  %v1420_v44 = vmul.f32 %v902_v39, %v902_v39  ;;  %839 = vst.msk [vmem:[#allocation2 + $0x40] sm:$0xff] %vm19_vm1, %v774_v32  ;;  %v777_v61 = vadd.f32 %v1874_v33, %v95_v46  ;;  %v2364_v26 = vld [vmem:[#allocation2 + $0x100] sm:$0xff] }
  0xee   :  { %v905_v45 = vld [vmem:[#allocation2 + $0x38] sm:$0xff]  ;;  %1225 = vst.msk [vmem:[%s3095_s2 + $0x18] sm:$0xf] %vm1218_vm2, %v1770_v38  ;;  %v1486_v47 = vadd.f32 %v1485_v36, %v1484_v37  ;;  %v903_v49 = vld [vmem:[#allocation2 + $0x28] sm:$0xff]  ;;  %v1291_v53 = vadd.f32 %v1290_v43, %v1289_v42  ;;  %v1294_v0 = vsel %vm19_vm1, %v904_v31, 0.0  ;;  %v775_v2 = vadd.f32 %v546_v40, %v93_v50  ;;  %v102_v37 = vld [vmem:[#allocation2 + $0x90] sm:$0xff] }
  0xef   :  { %v1771_v48 = vpack.c.bf16 %v905_v45, %v905_v45  ;;  %1223 = vst.msk [vmem:[%s3095_s2 + $0x10] sm:$0xf] %vm1218_vm2, %v1768_v41  ;;  %v1487_v54 = vsel %vm19_vm1, %v1420_v44, 0.0  ;;  %v1769_v55 = vpack.c.bf16 %v903_v49, %v903_v49  ;;  %v1292_v59 = vsel %vm19_vm1, %v903_v49, 0.0  ;;  %1253 = vst.msk [vmem:[%s3095_s2 + $0x88] sm:$0xf] %vm1218_vm2, %v1798_v12 }
  0xf0   :  { %v1488_v58 = vadd.f32 %v1487_v54, %v1486_v47  ;;  %v1421_v60 = vmul.f32 %v903_v49, %v903_v49  ;;  %v1293_v1 = vadd.f32 %v1292_v59, %v1291_v53  ;;  %v1423_v8 = vmul.f32 %v905_v45, %v905_v45  ;;  %842 = vst.msk [vmem:[#allocation2 + $0x58] sm:$0xff] %vm19_vm1, %v777_v61  ;;  %v2368_v31 = vld [vmem:[#allocation2 + $0x118] sm:$0xff]  ;;  %v100_v42 = vld [vmem:[#allocation2 + $0x80] sm:$0xff] }
  0xf1   :  { %1226 = vst.msk [vmem:[%s3095_s2 + $0x1c] sm:$0xf] %vm1218_vm2, %v1771_v48  ;;  %1224 = vst.msk [vmem:[%s3095_s2 + $0x14] sm:$0xf] %vm1218_vm2, %v1769_v55  ;;  %v1877_v3 = vpop.f32.mrb[12].mxu0  ;;  %v1491_v20 = vsel %vm19_vm1, %v1422_v52, 0.0  ;;  %v1796_v38 = vpack.c.bf16 %v2364_v26, %v2364_v26  ;;  %v1799_v43 = vpack.c.bf16 %v2368_v31, %v2368_v31  ;;  %v1797_v47 = vpack.c.bf16 %v2376_v35, %v2376_v35 }
  0xf2   :  { %v1489_v9 = vsel %vm19_vm1, %v1421_v60, 0.0  ;;  %v780_v10 = vadd.f32 %v1877_v3, %v98_v56  ;;  %v559_v11 = vpop.f32.mrb[13].mxu0  ;;  %v1295_v14 = vadd.f32 %v1294_v0, %v1293_v1  ;;  %840 = vst.msk [vmem:[#allocation2 + $0x48] sm:$0xff] %vm19_vm1, %v775_v2  ;;  %v1296_v21 = vsel %vm19_vm1, %v905_v45, 0.0  ;;  %v103_v3 = vld [vmem:[#allocation2 + $0x98] sm:$0xff] }
  0xf3   :  { %v1490_v15 = vadd.f32 %v1489_v9, %v1488_v58  ;;  %v2351_v16 = vld [vmem:[#allocation2 + $0x50] sm:$0xff]  ;;  %v778_v17 = vadd.f32 %v559_v11, %v96_v62  ;;  %v1878_v18 = vpop.f32.mrb[14].mxu0  ;;  %v1493_v32 = vsel %vm19_vm1, %v1423_v8, 0.0  ;;  %1251 = vst.msk [vmem:[%s3095_s2 + $0x80] sm:$0xf] %vm1218_vm2, %v1796_v38 }
  0xf4   :  { %v1774_v22 = vpack.c.bf16 %v2351_v16, %v2351_v16  ;;  %v906_v23 = vld [vmem:[#allocation2 + $0x40] sm:$0xff]  ;;  %845 = vst.msk [vmem:[#allocation2 + $0x70] sm:$0xff] %vm19_vm1, %v780_v10  ;;  %v781_v24 = vadd.f32 %v1878_v18, %v99_v4  ;;  %v562_v25 = vpop.f32.mrb[15].mxu0  ;;  %v1297_v29 = vadd.f32 %v1296_v21, %v1295_v14  ;;  %v1426_v49 = vmul.f32 %v2351_v16, %v2351_v16 }
  0xf5   :  { %v1492_v27 = vadd.f32 %v1491_v20, %v1490_v15  ;;  %v1772_v28 = vpack.c.bf16 %v906_v23, %v906_v23  ;;  %v1298_v30 = vsel %vm19_vm1, %v906_v23, 0.0  ;;  %843 = vst.msk [vmem:[#allocation2 + $0x60] sm:$0xff] %vm19_vm1, %v778_v17  ;;  %v1424_v33 = vmul.f32 %v906_v23, %v906_v23  ;;  %v2384_v39 = vpop.f32.mrb[8].mxu1 }
  0xf6   :  { %1229 = vst.msk [vmem:[%s3095_s2 + $0x28] sm:$0xf] %vm1218_vm2, %v1774_v22  ;;  %v779_v34 = vadd.f32 %v562_v25, %v97_v19  ;;  %v1299_v40 = vadd.f32 %v1298_v30, %v1297_v29  ;;  %v2390_v44 = vpop.f32.mrb[9].mxu1  ;;  %1254 = vst.msk [vmem:[%s3095_s2 + $0x8c] sm:$0xf] %vm1218_vm2, %v1799_v43  ;;  %v1302_v6 = vsel %vm19_vm1, %v2351_v16, 0.0 }
  0xf7   :  { %846 = vst.msk [vmem:[#allocation2 + $0x78] sm:$0xff] %vm19_vm1, %v781_v24  ;;  %v1494_v36 = vadd.f32 %v1493_v32, %v1492_v27  ;;  %v1495_v41 = vsel %vm19_vm1, %v1424_v33, 0.0  ;;  %v909_v45 = vld [vmem:[#allocation2 + $0x58] sm:$0xff]  ;;  %v2398_v48 = vpop.f32.mrb[10].mxu1  ;;  %v101_v16 = vld [vmem:[#allocation2 + $0x88] sm:$0xff]  ;;  %v1499_v17 = vsel %vm19_vm1, %v1426_v49, 0.0 }
  0xf8   :  { %1227 = vst.msk [vmem:[%s3095_s2 + $0x20] sm:$0xf] %vm1218_vm2, %v1772_v28  ;;  %v1775_v51 = vpack.c.bf16 %v909_v45, %v909_v45  ;;  %v2406_v55 = vpop.f32.mrb[11].mxu1  ;;  %1252 = vst.msk [vmem:[%s3095_s2 + $0x84] sm:$0xf] %vm1218_vm2, %v1797_v47  ;;  %v1427_v62 = vmul.f32 %v909_v45, %v909_v45  ;;  %v1304_v18 = vsel %vm19_vm1, %v909_v45, 0.0 }
  0xf9   :  { %844 = vst.msk [vmem:[#allocation2 + $0x68] sm:$0xff] %vm19_vm1, %v779_v34  ;;  %v1881_v46 = vpop.f32.mrb[16].mxu0  ;;  %v1496_v50 = vadd.f32 %v1495_v41, %v1494_v36  ;;  %v907_v52 = vld [vmem:[#allocation2 + $0x48] sm:$0xff]  ;;  %v106_v22 = vld [vmem:[#allocation2 + $0xb0] sm:$0xff]  ;;  %v104_v29 = vld [vmem:[#allocation2 + $0xa0] sm:$0xff] }
  0xfa   :  { %v784_v53 = vadd.f32 %v1881_v46, %v102_v37  ;;  %v575_v54 = vpop.f32.mrb[17].mxu0  ;;  %v1773_v56 = vpack.c.bf16 %v907_v52, %v907_v52  ;;  %v1300_v57 = vsel %vm19_vm1, %v907_v52, 0.0  ;;  %v1425_v58 = vmul.f32 %v907_v52, %v907_v52  ;;  %1230 = vst.msk [vmem:[%s3095_s2 + $0x2c] sm:$0xf] %vm1218_vm2, %v1775_v51  ;;  %v107_v51 = vld [vmem:[#allocation2 + $0xb8] sm:$0xff] }
  0xfb   :  { %v2409_v59 = vld [vmem:[#allocation2 + $0x70] sm:$0xff]  ;;  %v782_v60 = vadd.f32 %v575_v54, %v100_v42  ;;  %v1882_v61 = vpop.f32.mrb[18].mxu0  ;;  %v1301_v0 = vadd.f32 %v1300_v57, %v1299_v40  ;;  %v1501_v24 = vsel %vm19_vm1, %v1427_v62, 0.0 }
  0xfc   :  { %v1778_v1 = vpack.c.bf16 %v2409_v59, %v2409_v59  ;;  %v910_v2 = vld [vmem:[#allocation2 + $0x60] sm:$0xff]  ;;  %849 = vst.msk [vmem:[#allocation2 + $0x90] sm:$0xff] %vm19_vm1, %v784_v53  ;;  %v578_v4 = vpop.f32.mrb[19].mxu0  ;;  %v1497_v8 = vsel %vm19_vm1, %v1425_v58, 0.0  ;;  %v785_v21 = vadd.f32 %v1882_v61, %v103_v3  ;;  %v1430_v46 = vmul.f32 %v2409_v59, %v2409_v59  ;;  %v105_v53 = vld [vmem:[#allocation2 + $0xa8] sm:$0xff]  ;;  %v2472_v62 = vld [vmem:[#allocation2 + $0x130] sm:$0xff] }
  0xfd   :  { %1228 = vst.msk [vmem:[%s3095_s2 + $0x24] sm:$0xf] %vm1218_vm2, %v1773_v56  ;;  %v1776_v9 = vpack.c.bf16 %v910_v2, %v910_v2  ;;  %v1303_v11 = vadd.f32 %v1302_v6, %v1301_v0  ;;  %v1498_v12 = vadd.f32 %v1497_v8, %v1496_v50  ;;  %v1428_v14 = vmul.f32 %v910_v2, %v910_v2  ;;  %v2445_v23 = vpop.f32.mrb[12].mxu1 }
  0xfe   :  { %v2429_v10 = vld [vmem:[#allocation2 + $0x78] sm:$0xff]  ;;  %847 = vst.msk [vmem:[#allocation2 + $0x80] sm:$0xff] %vm19_vm1, %v782_v60  ;;  %v1306_v19 = vsel %vm19_vm1, %v910_v2, 0.0  ;;  %v2452_v30 = vpop.f32.mrb[13].mxu1  ;;  %850 = vst.msk [vmem:[#allocation2 + $0x98] sm:$0xff] %vm19_vm1, %v785_v21  ;;  %v783_v36 = vadd.f32 %v578_v4, %v101_v16  ;;  %v1310_v0 = vsel %vm19_vm1, %v2409_v59, 0.0 }
  0xff   :  { %1233 = vst.msk [vmem:[%s3095_s2 + $0x38] sm:$0xf] %vm1218_vm2, %v1778_v1  ;;  %v1779_v15 = vpack.c.bf16 %v2429_v10, %v2429_v10  ;;  %1231 = vst.msk [vmem:[%s3095_s2 + $0x30] sm:$0xf] %vm1218_vm2, %v1776_v9  ;;  %v1500_v25 = vadd.f32 %v1499_v17, %v1498_v12  ;;  %v1305_v27 = vadd.f32 %v1304_v18, %v1303_v11  ;;  %v1503_v32 = vsel %vm19_vm1, %v1428_v14, 0.0  ;;  %v2457_v38 = vpop.f32.mrb[14].mxu1 }
 0x100   :  { %v911_v20 = vld [vmem:[#allocation2 + $0x68] sm:$0xff]  ;;  %v2463_v45 = vpop.f32.mrb[15].mxu1  ;;  %848 = vst.msk [vmem:[#allocation2 + $0x88] sm:$0xff] %vm19_vm1, %v783_v36  ;;  %v1431_v56 = vmul.f32 %v2429_v10, %v2429_v10  ;;  %v120_v9 = vld [vmem:[#allocation2 + $0x120] sm:$0xff]  ;;  %v1507_v11 = vsel %vm19_vm1, %v1430_v46, 0.0  ;;  %v1312_v12 = vsel %vm19_vm1, %v2429_v10, 0.0 }
 0x101   :  { %1234 = vst.msk [vmem:[%s3095_s2 + $0x3c] sm:$0xf] %vm1218_vm2, %v1779_v15  ;;  %v1777_v28 = vpack.c.bf16 %v911_v20, %v911_v20  ;;  %v1308_v33 = vsel %vm19_vm1, %v911_v20, 0.0  ;;  %v1429_v34 = vmul.f32 %v911_v20, %v911_v20  ;;  %v1885_v37 = vpop.f32.mrb[20].mxu0  ;;  %v1307_v40 = vadd.f32 %v1306_v19, %v1305_v27  ;;  %v110_v14 = vld [vmem:[#allocation2 + $0xd0] sm:$0xff]  ;;  %v108_v46 = vld [vmem:[#allocation2 + $0xc0] sm:$0xff] }
 0x102   :  { %v1502_v41 = vadd.f32 %v1501_v24, %v1500_v25  ;;  %v788_v42 = vadd.f32 %v1885_v37, %v106_v22  ;;  %v591_v43 = vpop.f32.mrb[21].mxu0  ;;  %v1802_v15 = vpack.c.bf16 %v2472_v62, %v2472_v62  ;;  %v1509_v17 = vsel %vm19_vm1, %v1431_v56, 0.0  ;;  %v109_v56 = vld [vmem:[#allocation2 + $0xc8] sm:$0xff] }
 0x103   :  { %1232 = vst.msk [vmem:[%s3095_s2 + $0x34] sm:$0xf] %vm1218_vm2, %v1777_v28  ;;  %v1505_v47 = vsel %vm19_vm1, %v1429_v34, 0.0  ;;  %v916_v49 = vld [vmem:[#allocation2 + $0x90] sm:$0xff]  ;;  %v786_v50 = vadd.f32 %v591_v43, %v104_v29  ;;  %v1886_v52 = vpop.f32.mrb[22].mxu0  ;;  %v1309_v57 = vadd.f32 %v1308_v33, %v1307_v40  ;;  %v802_v27 = vadd.f32 %v2334_v63, %v120_v9 }
 0x104   :  { %v1504_v54 = vadd.f32 %v1503_v32, %v1502_v41  ;;  %v1782_v58 = vpack.c.bf16 %v916_v49, %v916_v49  ;;  %853 = vst.msk [vmem:[#allocation2 + $0xb0] sm:$0xff] %vm19_vm1, %v788_v42  ;;  %v594_v61 = vpop.f32.mrb[23].mxu0  ;;  %v789_v6 = vadd.f32 %v1886_v52, %v107_v51  ;;  %v1434_v21 = vmul.f32 %v916_v49, %v916_v49 }
 0x105   :  { %v914_v60 = vld [vmem:[#allocation2 + $0x80] sm:$0xff]  ;;  %851 = vst.msk [vmem:[#allocation2 + $0xa0] sm:$0xff] %vm19_vm1, %v786_v50  ;;  %v1311_v3 = vadd.f32 %v1310_v0, %v1309_v57  ;;  %v787_v8 = vadd.f32 %v594_v61, %v105_v53  ;;  %v2491_v16 = vpop.f32.mrb[16].mxu1  ;;  %v917_v20 = vld [vmem:[#allocation2 + $0x98] sm:$0xff]  ;;  %v1318_v40 = vsel %vm19_vm1, %v916_v49, 0.0  ;;  %867 = vst.msk [vmem:[#allocation2 + $0x120] sm:$0xff] %vm19_vm1, %v802_v27 }
 0x106   :  { %v1780_v1 = vpack.c.bf16 %v914_v60, %v914_v60  ;;  %v1432_v2 = vmul.f32 %v914_v60, %v914_v60  ;;  %v1506_v4 = vadd.f32 %v1505_v47, %v1504_v54  ;;  %1237 = vst.msk [vmem:[%s3095_s2 + $0x48] sm:$0xf] %vm1218_vm2, %v1782_v58  ;;  %v1314_v59 = vsel %vm19_vm1, %v914_v60, 0.0  ;;  %v2496_v10 = vpop.f32.mrb[17].mxu1  ;;  %1257 = vst.msk [vmem:[%s3095_s2 + $0x98] sm:$0xf] %vm1218_vm2, %v1802_v15 }
 0x107   :  { %v1313_v19 = vadd.f32 %v1312_v12, %v1311_v3  ;;  %854 = vst.msk [vmem:[#allocation2 + $0xb8] sm:$0xff] %vm19_vm1, %v789_v6  ;;  %852 = vst.msk [vmem:[#allocation2 + $0xa8] sm:$0xff] %vm19_vm1, %v787_v8  ;;  %v1783_v24 = vpack.c.bf16 %v917_v20, %v917_v20  ;;  %v2504_v28 = vpop.f32.mrb[18].mxu1  ;;  %v915_v33 = vld [vmem:[#allocation2 + $0x88] sm:$0xff]  ;;  %v111_v47 = vld [vmem:[#allocation2 + $0xd8] sm:$0xff]  ;;  %v1435_v52 = vmul.f32 %v917_v20, %v917_v20  ;;  %v1515_v60 = vsel %vm19_vm1, %v1434_v21, 0.0 }
 0x108   :  { %1235 = vst.msk [vmem:[%s3095_s2 + $0x40] sm:$0xf] %vm1218_vm2, %v1780_v1  ;;  %v1508_v18 = vadd.f32 %v1507_v11, %v1506_v4  ;;  %v1511_v22 = vsel %vm19_vm1, %v1432_v2, 0.0  ;;  %v2506_v37 = vpop.f32.mrb[19].mxu1  ;;  %v1781_v41 = vpack.c.bf16 %v915_v33, %v915_v33  ;;  %v1316_v42 = vsel %vm19_vm1, %v915_v33, 0.0  ;;  %v123_v58 = vld [vmem:[#allocation2 + $0x138] sm:$0xff] }
 0x109   :  { %v1889_v25 = vpop.f32.mrb[24].mxu0  ;;  %v1315_v29 = vadd.f32 %v1314_v59, %v1313_v19  ;;  %1238 = vst.msk [vmem:[%s3095_s2 + $0x4c] sm:$0xf] %vm1218_vm2, %v1783_v24  ;;  %v1433_v63 = vmul.f32 %v915_v33, %v915_v33  ;;  %v1320_v61 = vsel %vm19_vm1, %v917_v20, 0.0  ;;  %v805_v15 = vadd.f32 %v2343_v7, %v123_v58 }
 0x10a   :  { %v1510_v32 = vadd.f32 %v1509_v17, %v1508_v18  ;;  %v792_v34 = vadd.f32 %v1889_v25, %v110_v14  ;;  %v607_v36 = vpop.f32.mrb[25].mxu0  ;;  %1236 = vst.msk [vmem:[%s3095_s2 + $0x44] sm:$0xf] %vm1218_vm2, %v1781_v41  ;;  %v114_v14 = vld [vmem:[#allocation2 + $0xf0] sm:$0xff]  ;;  %v1517_v18 = vsel %vm19_vm1, %v1435_v52, 0.0 }
 0x10b   :  { %v2514_v43 = vld [vmem:[#allocation2 + $0xb0] sm:$0xff]  ;;  %v1890_v50 = vpop.f32.mrb[26].mxu0  ;;  %v1317_v53 = vadd.f32 %v1316_v42, %v1315_v29  ;;  %v1513_v0 = vsel %vm19_vm1, %v1433_v63, 0.0  ;;  %v790_v6 = vadd.f32 %v607_v36, %v108_v46  ;;  %870 = vst.msk [vmem:[#allocation2 + $0x138] sm:$0xff] %vm19_vm1, %v805_v15  ;;  %v115_v63 = vld [vmem:[#allocation2 + $0xf8] sm:$0xff]  ;;  %v113_v46 = vld [vmem:[#allocation2 + $0xe8] sm:$0xff] }
 0x10c   :  { %v1512_v51 = vadd.f32 %v1511_v22, %v1510_v32  ;;  %v1786_v49 = vpack.c.bf16 %v2514_v43, %v2514_v43  ;;  %v918_v54 = vld [vmem:[#allocation2 + $0xa0] sm:$0xff]  ;;  %857 = vst.msk [vmem:[#allocation2 + $0xd0] sm:$0xff] %vm19_vm1, %v792_v34  ;;  %v610_v57 = vpop.f32.mrb[27].mxu0  ;;  %v793_v12 = vadd.f32 %v1890_v50, %v111_v47  ;;  %v1438_v25 = vmul.f32 %v2514_v43, %v2514_v43 }
 0x10d   :  { %v1784_v1 = vpack.c.bf16 %v918_v54, %v918_v54  ;;  %v1319_v2 = vadd.f32 %v1318_v40, %v1317_v53  ;;  %v1436_v4 = vmul.f32 %v918_v54, %v918_v54  ;;  %v1322_v8 = vsel %vm19_vm1, %v918_v54, 0.0  ;;  %v2537_v17 = vpop.f32.mrb[20].mxu1  ;;  %855 = vst.msk [vmem:[#allocation2 + $0xc0] sm:$0xff] %vm19_vm1, %v790_v6  ;;  %v112_v22 = vld [vmem:[#allocation2 + $0xe0] sm:$0xff]  ;;  %v121_v54 = vld [vmem:[#allocation2 + $0x128] sm:$0xff] }
 0x10e   :  { %v1514_v3 = vadd.f32 %v1513_v0, %v1512_v51  ;;  %1241 = vst.msk [vmem:[%s3095_s2 + $0x58] sm:$0xf] %vm1218_vm2, %v1786_v49  ;;  %v921_v9 = vld [vmem:[#allocation2 + $0xb8] sm:$0xff]  ;;  %v919_v11 = vld [vmem:[#allocation2 + $0xa8] sm:$0xff]  ;;  %v791_v59 = vadd.f32 %v610_v57, %v109_v56  ;;  %v2541_v24 = vpop.f32.mrb[21].mxu1  ;;  %v2556_v47 = vld [vmem:[#allocation2 + $0x120] sm:$0xff] }
 0x10f   :  { %1239 = vst.msk [vmem:[%s3095_s2 + $0x50] sm:$0xf] %vm1218_vm2, %v1784_v1  ;;  %v1321_v20 = vadd.f32 %v1320_v61, %v1319_v2  ;;  %v1787_v21 = vpack.c.bf16 %v921_v9, %v921_v9  ;;  %v1519_v27 = vsel %vm19_vm1, %v1436_v4, 0.0  ;;  %v1785_v29 = vpack.c.bf16 %v919_v11, %v919_v11  ;;  %v2550_v33 = vpop.f32.mrb[22].mxu1  ;;  %v126_v0 = vld [vmem:[#allocation2 + $0x150] sm:$0xff]  ;;  %v124_v1 = vld [vmem:[#allocation2 + $0x140] sm:$0xff] }
 0x110   :  { %v1516_v19 = vadd.f32 %v1515_v60, %v1514_v3  ;;  %v1324_v7 = vsel %vm19_vm1, %v919_v11, 0.0  ;;  %858 = vst.msk [vmem:[#allocation2 + $0xd8] sm:$0xff] %vm19_vm1, %v793_v12  ;;  %856 = vst.msk [vmem:[#allocation2 + $0xc8] sm:$0xff] %vm19_vm1, %v791_v59  ;;  %v1437_v40 = vmul.f32 %v919_v11, %v919_v11  ;;  %v2558_v50 = vpop.f32.mrb[23].mxu1  ;;  %v1800_v49 = vpack.c.bf16 %v2556_v47, %v2556_v47  ;;  %v127_v2 = vld [vmem:[#allocation2 + $0x158] sm:$0xff] }
 0x111   :  { %v1893_v32 = vpop.f32.mrb[28].mxu0  ;;  %v1323_v34 = vadd.f32 %v1322_v8, %v1321_v20  ;;  %1242 = vst.msk [vmem:[%s3095_s2 + $0x5c] sm:$0xf] %vm1218_vm2, %v1787_v21  ;;  %1240 = vst.msk [vmem:[%s3095_s2 + $0x54] sm:$0xf] %vm1218_vm2, %v1785_v29  ;;  %v1326_v3 = vsel %vm19_vm1, %v2514_v43, 0.0  ;;  %v1439_v4 = vmul.f32 %v921_v9, %v921_v9  ;;  %v803_v43 = vadd.f32 %v2349_v13, %v121_v54 }
 0x112   :  { %v1518_v36 = vadd.f32 %v1517_v18, %v1516_v19  ;;  %v796_v41 = vadd.f32 %v1893_v32, %v114_v14  ;;  %v623_v42 = vpop.f32.mrb[29].mxu0  ;;  %v1521_v58 = vsel %vm19_vm1, %v1437_v40, 0.0  ;;  %1255 = vst.msk [vmem:[%s3095_s2 + $0x90] sm:$0xf] %vm1218_vm2, %v1800_v49  ;;  %v1523_v11 = vsel %vm19_vm1, %v1438_v25, 0.0  ;;  %v2621_v54 = vld [vmem:[#allocation2 + $0x138] sm:$0xff] }
 0x113   :  { %v2564_v51 = vld [vmem:[#allocation2 + $0xd0] sm:$0xff]  ;;  %v794_v52 = vadd.f32 %v623_v42, %v112_v22  ;;  %v1894_v53 = vpop.f32.mrb[30].mxu0  ;;  %v1325_v57 = vadd.f32 %v1324_v7, %v1323_v34  ;;  %v1328_v14 = vsel %vm19_vm1, %v921_v9, 0.0  ;;  %v808_v18 = vadd.f32 %v2384_v39, %v126_v0  ;;  %868 = vst.msk [vmem:[#allocation2 + $0x128] sm:$0xff] %vm19_vm1, %v803_v43 }
 0x114   :  { %v1520_v56 = vadd.f32 %v1519_v27, %v1518_v36  ;;  %v1790_v60 = vpack.c.bf16 %v2564_v51, %v2564_v51  ;;  %861 = vst.msk [vmem:[#allocation2 + $0xf0] sm:$0xff] %vm19_vm1, %v796_v41  ;;  %v626_v61 = vpop.f32.mrb[31].mxu0  ;;  %v797_v6 = vadd.f32 %v1894_v53, %v115_v63  ;;  %v922_v15 = vld [vmem:[#allocation2 + $0xc0] sm:$0xff]  ;;  %v806_v19 = vadd.f32 %v2390_v44, %v124_v1 }
 0x115   :  { %859 = vst.msk [vmem:[#allocation2 + $0xe0] sm:$0xff] %vm19_vm1, %v794_v52  ;;  %v795_v8 = vadd.f32 %v626_v61, %v113_v46  ;;  %v1327_v12 = vadd.f32 %v1326_v3, %v1325_v57  ;;  %v809_v20 = vadd.f32 %v2398_v48, %v127_v2  ;;  %v2591_v21 = vpop.f32.mrb[24].mxu1  ;;  %v1788_v25 = vpack.c.bf16 %v922_v15, %v922_v15 }
 0x116   :  { %v1522_v59 = vadd.f32 %v1521_v58, %v1520_v56  ;;  %1245 = vst.msk [vmem:[%s3095_s2 + $0x68] sm:$0xf] %vm1218_vm2, %v1790_v60  ;;  %v1330_v13 = vsel %vm19_vm1, %v922_v15, 0.0  ;;  %v2595_v7 = vpop.f32.mrb[25].mxu1  ;;  %v1525_v32 = vsel %vm19_vm1, %v1439_v4, 0.0  ;;  %v1440_v39 = vmul.f32 %v922_v15, %v922_v15 }
 0x117   :  { %862 = vst.msk [vmem:[#allocation2 + $0xf8] sm:$0xff] %vm19_vm1, %v797_v6  ;;  %860 = vst.msk [vmem:[#allocation2 + $0xe8] sm:$0xff] %vm19_vm1, %v795_v8  ;;  %v1329_v27 = vadd.f32 %v1328_v14, %v1327_v12  ;;  %v925_v29 = vld [vmem:[#allocation2 + $0xd8] sm:$0xff]  ;;  %v923_v9 = vld [vmem:[#allocation2 + $0xc8] sm:$0xff]  ;;  %v2601_v44 = vpop.f32.mrb[26].mxu1  ;;  %v1442_v63 = vmul.f32 %v2564_v51, %v2564_v51  ;;  %v2619_v49 = vsel %vm19_vm1, %v2341_v5, 0.0  ;;  %v1450_v61 = vmul.f32 %v2341_v5, %v2341_v5 }
 0x118   :  { %v1524_v22 = vadd.f32 %v1523_v11, %v1522_v59  ;;  %v1791_v34 = vpack.c.bf16 %v925_v29, %v925_v29  ;;  %873 = vst.msk [vmem:[#allocation2 + $0x150] sm:$0xff] %vm19_vm1, %v808_v18  ;;  %871 = vst.msk [vmem:[#allocation2 + $0x140] sm:$0xff] %vm19_vm1, %v806_v19  ;;  %v1789_v40 = vpack.c.bf16 %v923_v9, %v923_v9  ;;  %v1332_v41 = vsel %vm19_vm1, %v923_v9, 0.0  ;;  %v2608_v42 = vpop.f32.mrb[27].mxu1 }
 0x119   :  { %874 = vst.msk [vmem:[#allocation2 + $0x158] sm:$0xff] %vm19_vm1, %v809_v20  ;;  %v1331_v48 = vadd.f32 %v1330_v13, %v1329_v27  ;;  %v1527_v46 = vsel %vm19_vm1, %v1440_v39, 0.0  ;;  %v1441_v52 = vmul.f32 %v923_v9, %v923_v9  ;;  %v1334_v0 = vsel %vm19_vm1, %v2564_v51, 0.0 }
 0x11a   :  { %1243 = vst.msk [vmem:[%s3095_s2 + $0x60] sm:$0xf] %vm1218_vm2, %v1788_v25  ;;  %v1526_v36 = vadd.f32 %v1525_v32, %v1524_v22  ;;  %1246 = vst.msk [vmem:[%s3095_s2 + $0x6c] sm:$0xf] %vm1218_vm2, %v1791_v34  ;;  %v1443_v1 = vmul.f32 %v925_v29, %v925_v29  ;;  %v1803_v5 = vpack.c.bf16 %v2621_v54, %v2621_v54  ;;  %v1531_v59 = vsel %vm19_vm1, %v1442_v63, 0.0  ;;  %v2645_v15 = vld [vmem:[#allocation2 + $0x128] sm:$0xff] }
 0x11b   :  { %v928_v53 = vld [vmem:[#allocation2 + $0xf0] sm:$0xff]  ;;  %1244 = vst.msk [vmem:[%s3095_s2 + $0x64] sm:$0xf] %vm1218_vm2, %v1789_v40  ;;  %v1333_v57 = vadd.f32 %v1332_v41, %v1331_v48  ;;  %v1529_v2 = vsel %vm19_vm1, %v1441_v52, 0.0  ;;  %v1336_v51 = vsel %vm19_vm1, %v925_v29, 0.0  ;;  %v2650_v25 = vsel %vm19_vm1, %v1450_v61, 0.0 }
 0x11c   :  { %v1528_v56 = vadd.f32 %v1527_v46, %v1526_v36  ;;  %v1794_v58 = vpack.c.bf16 %v928_v53, %v928_v53  ;;  %v926_v60 = vld [vmem:[#allocation2 + $0xe0] sm:$0xff]  ;;  %1258 = vst.msk [vmem:[%s3095_s2 + $0x9c] sm:$0xf] %vm1218_vm2, %v1803_v5  ;;  %v1533_v29 = vsel %vm19_vm1, %v1443_v1, 0.0  ;;  %v1448_v40 = vmul.f32 %v2364_v26, %v2364_v26 }
 0x11d   :  { %v1792_v3 = vpack.c.bf16 %v926_v60, %v926_v60  ;;  %v1335_v4 = vadd.f32 %v1334_v0, %v1333_v57  ;;  %v1444_v8 = vmul.f32 %v926_v60, %v926_v60  ;;  %v1338_v43 = vsel %vm19_vm1, %v926_v60, 0.0  ;;  %v2647_v18 = vpop.f32.mrb[28].mxu1 }
 0x11e   :  { %v1530_v6 = vadd.f32 %v1529_v2, %v1528_v56  ;;  %1249 = vst.msk [vmem:[%s3095_s2 + $0x78] sm:$0xf] %vm1218_vm2, %v1794_v58  ;;  %v929_v11 = vld [vmem:[#allocation2 + $0xf8] sm:$0xff]  ;;  %v927_v12 = vld [vmem:[#allocation2 + $0xe8] sm:$0xff]  ;;  %v2658_v13 = vpop.f32.mrb[29].mxu1  ;;  %v1801_v41 = vpack.c.bf16 %v2645_v15, %v2645_v15  ;;  %v1446_v52 = vmul.f32 %v928_v53, %v928_v53  ;;  %v1449_v57 = vmul.f32 %v2376_v35, %v2376_v35 }
 0x11f   :  { %1247 = vst.msk [vmem:[%s3095_s2 + $0x70] sm:$0xf] %vm1218_vm2, %v1792_v3  ;;  %v1795_v14 = vpack.c.bf16 %v929_v11, %v929_v11  ;;  %v1337_v20 = vadd.f32 %v1336_v51, %v1335_v4  ;;  %v1793_v22 = vpack.c.bf16 %v927_v12, %v927_v12  ;;  %v2656_v27 = vld [vmem:[#allocation2 + $0x150] sm:$0xff]  ;;  %v1535_v9 = vsel %vm19_vm1, %v1444_v8, 0.0  ;;  %v2667_v34 = vpop.f32.mrb[30].mxu1  ;;  %v2677_v63 = vld [vmem:[#allocation2 + $0x140] sm:$0xff] }
 0x120   :  { %v1532_v19 = vadd.f32 %v1531_v59, %v1530_v6  ;;  %v1340_v32 = vsel %vm19_vm1, %v927_v12, 0.0  ;;  %v1445_v39 = vmul.f32 %v927_v12, %v927_v12  ;;  %v2679_v46 = vpop.f32.mrb[31].mxu1  ;;  %v1806_v58 = vpack.c.bf16 %v2656_v27, %v2656_v27  ;;  %v2686_v60 = vld [vmem:[#allocation2 + $0x158] sm:$0xff]  ;;  %1256 = vst.msk [vmem:[%s3095_s2 + $0x94] sm:$0xf] %vm1218_vm2, %v1801_v41  ;;  %v125_v3 = vld [vmem:[#allocation2 + $0x148] sm:$0xff] }
 0x121   :  { %1250 = vst.msk [vmem:[%s3095_s2 + $0x7c] sm:$0xf] %vm1218_vm2, %v1795_v14  ;;  %v1339_v48 = vadd.f32 %v1338_v43, %v1337_v20  ;;  %1248 = vst.msk [vmem:[%s3095_s2 + $0x74] sm:$0xf] %vm1218_vm2, %v1793_v22  ;;  %v1346_v1 = vsel %vm19_vm1, %v2364_v26, 0.0  ;;  %v2692_v2 = vmul.f32 %v2368_v31, %v2368_v31  ;;  %v1342_v4 = vsel %vm19_vm1, %v928_v53, 0.0 }
 0x122   :  { %v1534_v36 = vadd.f32 %v1533_v29, %v1532_v19  ;;  %v1537_v56 = vsel %vm19_vm1, %v1445_v39, 0.0  ;;  %v1447_v6 = vmul.f32 %v929_v11, %v929_v11  ;;  %v1348_v8 = vsel %vm19_vm1, %v2376_v35, 0.0  ;;  %1261 = vst.msk [vmem:[%s3095_s2 + $0xa8] sm:$0xf] %vm1218_vm2, %v1806_v58  ;;  %v130_v12 = vld [vmem:[#allocation2 + $0x170] sm:$0xff]  ;;  %v128_v43 = vld [vmem:[#allocation2 + $0x160] sm:$0xff] }
 0x123   :  { %v1341_v0 = vadd.f32 %v1340_v32, %v1339_v48  ;;  %v1804_v26 = vpack.c.bf16 %v2677_v63, %v2677_v63  ;;  %v1543_v51 = vsel %vm19_vm1, %v1448_v40, 0.0  ;;  %v1807_v53 = vpack.c.bf16 %v2686_v60, %v2686_v60  ;;  %v131_v14 = vld [vmem:[#allocation2 + $0x178] sm:$0xff]  ;;  %v129_v19 = vld [vmem:[#allocation2 + $0x168] sm:$0xff]  ;;  %v132_v32 = vld [vmem:[#allocation2 + $0x180] sm:$0xff] }
 0x124   :  { %v1536_v61 = vadd.f32 %v1535_v9, %v1534_v36  ;;  %v1539_v35 = vsel %vm19_vm1, %v1446_v52, 0.0  ;;  %v1344_v20 = vsel %vm19_vm1, %v929_v11, 0.0  ;;  %v1545_v22 = vsel %vm19_vm1, %v1449_v57, 0.0  ;;  %v134_v9 = vld [vmem:[#allocation2 + $0x190] sm:$0xff]  ;;  %v135_v39 = vld [vmem:[#allocation2 + $0x198] sm:$0xff]  ;;  %v133_v41 = vld [vmem:[#allocation2 + $0x188] sm:$0xff] }
 0x125   :  { %v1343_v5 = vadd.f32 %v1342_v4, %v1341_v0  ;;  %1259 = vst.msk [vmem:[%s3095_s2 + $0xa0] sm:$0xf] %vm1218_vm2, %v1804_v26  ;;  %v807_v29 = vadd.f32 %v2406_v55, %v125_v3  ;;  %v2720_v40 = vmul.f32 %v2556_v47, %v2556_v47  ;;  %1262 = vst.msk [vmem:[%s3095_s2 + $0xac] sm:$0xf] %vm1218_vm2, %v1807_v53  ;;  %v138_v52 = vld [vmem:[#allocation2 + $0x1b0] sm:$0xff]  ;;  %v1541_v55 = vsel %vm19_vm1, %v1447_v6, 0.0 }
 0x126   :  { %v1538_v59 = vadd.f32 %v1537_v56, %v1536_v61  ;;  %v812_v11 = vadd.f32 %v2445_v23, %v130_v12  ;;  %v136_v56 = vld [vmem:[#allocation2 + $0x1a0] sm:$0xff]  ;;  %v810_v57 = vadd.f32 %v2452_v30, %v128_v43  ;;  %v813_v58 = vadd.f32 %v2457_v38, %v131_v14  ;;  %v139_v0 = vld [vmem:[#allocation2 + $0x1b8] sm:$0xff]  ;;  %v137_v3 = vld [vmem:[#allocation2 + $0x1a8] sm:$0xff] }
 0x127   :  { %v1345_v36 = vadd.f32 %v1344_v20, %v1343_v5  ;;  %872 = vst.msk [vmem:[#allocation2 + $0x148] sm:$0xff] %vm19_vm1, %v807_v29  ;;  %v811_v61 = vadd.f32 %v2463_v45, %v129_v19  ;;  %v142_v4 = vld [vmem:[#allocation2 + $0x1d0] sm:$0xff]  ;;  %v816_v23 = vadd.f32 %v2491_v16, %v134_v9  ;;  %v814_v12 = vadd.f32 %v2496_v10, %v132_v32  ;;  %v140_v6 = vld [vmem:[#allocation2 + $0x1c0] sm:$0xff]  ;;  %v141_v53 = vld [vmem:[#allocation2 + $0x1c8] sm:$0xff] }
 0x128   :  { %v1540_v48 = vadd.f32 %v1539_v35, %v1538_v59  ;;  %877 = vst.msk [vmem:[#allocation2 + $0x170] sm:$0xff] %vm19_vm1, %v812_v11  ;;  %v143_v59 = vld [vmem:[#allocation2 + $0x1d8] sm:$0xff]  ;;  %875 = vst.msk [vmem:[#allocation2 + $0x160] sm:$0xff] %vm19_vm1, %v810_v57  ;;  %v817_v30 = vadd.f32 %v2504_v28, %v135_v39  ;;  %v815_v38 = vadd.f32 %v2506_v37, %v133_v41  ;;  %v146_v16 = vld [vmem:[#allocation2 + $0x1f0] sm:$0xff]  ;;  %v1356_v11 = vsel %vm19_vm1, %v2645_v15, 0.0 }
 0x129   :  { %v1347_v26 = vadd.f32 %v1346_v1, %v1345_v36  ;;  %878 = vst.msk [vmem:[#allocation2 + $0x178] sm:$0xff] %vm19_vm1, %v813_v58  ;;  %876 = vst.msk [vmem:[#allocation2 + $0x168] sm:$0xff] %vm19_vm1, %v811_v61  ;;  %v820_v45 = vadd.f32 %v2537_v17, %v138_v52  ;;  %v818_v1 = vadd.f32 %v2541_v24, %v136_v56  ;;  %v144_v43 = vld [vmem:[#allocation2 + $0x1e0] sm:$0xff]  ;;  %v147_v20 = vld [vmem:[#allocation2 + $0x1f8] sm:$0xff]  ;;  %v1358_v52 = vsel %vm19_vm1, %v2472_v62, 0.0 }
 0x12a   :  { %v1542_v5 = vadd.f32 %v1541_v55, %v1540_v48  ;;  %881 = vst.msk [vmem:[#allocation2 + $0x190] sm:$0xff] %vm19_vm1, %v816_v23  ;;  %879 = vst.msk [vmem:[#allocation2 + $0x180] sm:$0xff] %vm19_vm1, %v814_v12  ;;  %v821_v19 = vadd.f32 %v2550_v33, %v139_v0  ;;  %v819_v35 = vadd.f32 %v2558_v50, %v137_v3  ;;  %v145_v28 = vld [vmem:[#allocation2 + $0x1e8] sm:$0xff] }
 0x12b   :  { %v1349_v14 = vadd.f32 %v1348_v8, %v1347_v26  ;;  %882 = vst.msk [vmem:[#allocation2 + $0x198] sm:$0xff] %vm19_vm1, %v817_v30  ;;  %880 = vst.msk [vmem:[#allocation2 + $0x188] sm:$0xff] %vm19_vm1, %v815_v38  ;;  %v824_v37 = vadd.f32 %v2591_v21, %v142_v4  ;;  %v822_v17 = vadd.f32 %v2595_v7, %v140_v6  ;;  %v1352_v21 = vsel %vm19_vm1, %v2368_v31, 0.0 }
 0x12c   :  { %v1544_v10 = vadd.f32 %v1543_v51, %v1542_v5  ;;  %885 = vst.msk [vmem:[#allocation2 + $0x1b0] sm:$0xff] %vm19_vm1, %v820_v45  ;;  %883 = vst.msk [vmem:[#allocation2 + $0x1a0] sm:$0xff] %vm19_vm1, %v818_v1  ;;  %v825_v24 = vadd.f32 %v2601_v44, %v143_v59  ;;  %v823_v33 = vadd.f32 %v2608_v42, %v141_v53  ;;  %v1354_v7 = vsel %vm19_vm1, %v2556_v47, 0.0 }
 0x12d   :  { %v1351_v50 = vadd.f32 %v2619_v49, %v1349_v14  ;;  %886 = vst.msk [vmem:[#allocation2 + $0x1b8] sm:$0xff] %vm19_vm1, %v821_v19  ;;  %884 = vst.msk [vmem:[#allocation2 + $0x1a8] sm:$0xff] %vm19_vm1, %v819_v35  ;;  %v828_v51 = vadd.f32 %v2647_v18, %v146_v16  ;;  %v826_v29 = vadd.f32 %v2658_v13, %v144_v43  ;;  %v1549_v31 = vsel %vm19_vm1, %v2692_v2, 0.0 }
 0x12e   :  { %v1546_v8 = vadd.f32 %v1545_v22, %v1544_v10  ;;  %889 = vst.msk [vmem:[#allocation2 + $0x1d0] sm:$0xff] %vm19_vm1, %v824_v37  ;;  %887 = vst.msk [vmem:[#allocation2 + $0x1c0] sm:$0xff] %vm19_vm1, %v822_v17  ;;  %v829_v44 = vadd.f32 %v2667_v34, %v147_v20  ;;  %v827_v42 = vadd.f32 %v2679_v46, %v145_v28  ;;  %v2770_v13 = vld [vmem:[#allocation2 + $0x148] sm:$0xff]  ;;  %v1551_v47 = vsel %vm19_vm1, %v2720_v40, 0.0 }
 0x12f   :  { %890 = vst.msk [vmem:[#allocation2 + $0x1d8] sm:$0xff] %vm19_vm1, %v825_v24  ;;  %888 = vst.msk [vmem:[#allocation2 + $0x1c8] sm:$0xff] %vm19_vm1, %v823_v33  ;;  %v1353_v18 = vadd.f32 %v1352_v21, %v1351_v50  ;;  %v1453_v34 = vmul.f32 %v2645_v15, %v2645_v15  ;;  %v1805_v46 = vpack.c.bf16 %v2770_v13, %v2770_v13  ;;  %v2790_v39 = vld [vmem:[#allocation2 + $0x160] sm:$0xff]  ;;  %v1360_v26 = vsel %vm19_vm1, %v2621_v54, 0.0 }
 0x130   :  { %v1548_v49 = vadd.f32 %v2650_v25, %v1546_v8  ;;  %893 = vst.msk [vmem:[#allocation2 + $0x1f0] sm:$0xff] %vm19_vm1, %v828_v51  ;;  %891 = vst.msk [vmem:[#allocation2 + $0x1e0] sm:$0xff] %vm19_vm1, %v826_v29  ;;  %v2782_v25 = vld [vmem:[#allocation2 + $0x170] sm:$0xff]  ;;  %v1454_v22 = vmul.f32 %v2472_v62, %v2472_v62  ;;  %v2792_v48 = vld [vmem:[#allocation2 + $0x178] sm:$0xff]  ;;  %v1455_v40 = vmul.f32 %v2621_v54, %v2621_v54  ;;  %v1362_v59 = vsel %vm19_vm1, %v2677_v63, 0.0 }
 0x131   :  { %894 = vst.msk [vmem:[#allocation2 + $0x1f8] sm:$0xff] %vm19_vm1, %v829_v44  ;;  %892 = vst.msk [vmem:[#allocation2 + $0x1e8] sm:$0xff] %vm19_vm1, %v827_v42  ;;  %v1355_v9 = vadd.f32 %v1354_v7, %v1353_v18  ;;  %v1810_v32 = vpack.c.bf16 %v2782_v25, %v2782_v25  ;;  %v2794_v36 = vld [vmem:[#allocation2 + $0x168] sm:$0xff]  ;;  %v1808_v41 = vpack.c.bf16 %v2790_v39, %v2790_v39  ;;  %v2814_v57 = vld [vmem:[#allocation2 + $0x190] sm:$0xff]  ;;  %v1553_v58 = vsel %vm19_vm1, %v1453_v34, 0.0 }
 0x132   :  { %v1550_v2 = vadd.f32 %v1549_v31, %v1548_v49  ;;  %1260 = vst.msk [vmem:[%s3095_s2 + $0xa4] sm:$0xf] %vm1218_vm2, %v1805_v46  ;;  %v1811_v15 = vpack.c.bf16 %v2792_v48, %v2792_v48  ;;  %v1458_v61 = vmul.f32 %v2656_v27, %v2656_v27  ;;  %v1456_v62 = vmul.f32 %v2677_v63, %v2677_v63  ;;  %v2827_v3 = vld [vmem:[#allocation2 + $0x180] sm:$0xff]  ;;  %v2836_v12 = vld [vmem:[#allocation2 + $0x198] sm:$0xff]  ;;  %v2849_v30 = vld [vmem:[#allocation2 + $0x188] sm:$0xff] }
 0x133   :  { %v1357_v55 = vadd.f32 %v1356_v11, %v1355_v9  ;;  %1265 = vst.msk [vmem:[%s3095_s2 + $0xb8] sm:$0xf] %vm1218_vm2, %v1810_v32  ;;  %1263 = vst.msk [vmem:[%s3095_s2 + $0xb0] sm:$0xf] %vm1218_vm2, %v1808_v41  ;;  %v1809_v0 = vpack.c.bf16 %v2794_v36, %v2794_v36  ;;  %v1555_v4 = vsel %vm19_vm1, %v1454_v22, 0.0  ;;  %v1557_v6 = vsel %vm19_vm1, %v1455_v40, 0.0 }
 0x134   :  { %v1552_v56 = vadd.f32 %v1551_v47, %v1550_v2  ;;  %1266 = vst.msk [vmem:[%s3095_s2 + $0xbc] sm:$0xf] %vm1218_vm2, %v1811_v15  ;;  %v1457_v53 = vmul.f32 %v2770_v13, %v2770_v13  ;;  %v1814_v54 = vpack.c.bf16 %v2814_v57, %v2814_v57  ;;  %v1366_v45 = vsel %vm19_vm1, %v2656_v27, 0.0  ;;  %v2855_v16 = vld [vmem:[#allocation2 + $0x1a0] sm:$0xff]  ;;  %v2867_v19 = vld [vmem:[#allocation2 + $0x1a8] sm:$0xff]  ;;  %v2869_v35 = vld [vmem:[#allocation2 + $0x1b0] sm:$0xff] }
 0x135   :  { %v1359_v5 = vadd.f32 %v1358_v52, %v1357_v55  ;;  %1264 = vst.msk [vmem:[%s3095_s2 + $0xb4] sm:$0xf] %vm1218_vm2, %v1809_v0  ;;  %v1812_v63 = vpack.c.bf16 %v2827_v3, %v2827_v3  ;;  %v1563_v43 = vsel %vm19_vm1, %v1458_v61, 0.0  ;;  %v1559_v10 = vsel %vm19_vm1, %v1456_v62, 0.0  ;;  %v2879_v24 = vld [vmem:[#allocation2 + $0x1b8] sm:$0xff]  ;;  %v2881_v33 = vld [vmem:[#allocation2 + $0x1c0] sm:$0xff] }
 0x136   :  { %v1554_v23 = vadd.f32 %v1553_v58, %v1552_v56  ;;  %v1368_v14 = vsel %vm19_vm1, %v2686_v60, 0.0  ;;  %1269 = vst.msk [vmem:[%s3095_s2 + $0xc8] sm:$0xf] %vm1218_vm2, %v1814_v54  ;;  %v1815_v27 = vpack.c.bf16 %v2836_v12, %v2836_v12  ;;  %v1459_v37 = vmul.f32 %v2686_v60, %v2686_v60  ;;  %v2883_v50 = vld [vmem:[#allocation2 + $0x1c8] sm:$0xff]  ;;  %v2896_v21 = vld [vmem:[#allocation2 + $0x1d0] sm:$0xff]  ;;  %v2898_v7 = vld [vmem:[#allocation2 + $0x1d8] sm:$0xff] }
 0x137   :  { %v1361_v1 = vadd.f32 %v1360_v26, %v1359_v5  ;;  %1267 = vst.msk [vmem:[%s3095_s2 + $0xc0] sm:$0xf] %vm1218_vm2, %v1812_v63  ;;  %v1813_v17 = vpack.c.bf16 %v2849_v30, %v2849_v30  ;;  %v1364_v8 = vsel %vm19_vm1, %v2770_v13, 0.0  ;;  %v1561_v51 = vsel %vm19_vm1, %v1457_v53, 0.0  ;;  %v2900_v44 = vld [vmem:[#allocation2 + $0x1e0] sm:$0xff]  ;;  %v2908_v13 = vld [vmem:[#allocation2 + $0x1f0] sm:$0xff] }
 0x138   :  { %v1556_v38 = vadd.f32 %v1555_v4, %v1554_v23  ;;  %v1370_v60 = vsel %vm19_vm1, %v2790_v39, 0.0  ;;  %1270 = vst.msk [vmem:[%s3095_s2 + $0xcc] sm:$0xf] %vm1218_vm2, %v1815_v27  ;;  %v1816_v29 = vpack.c.bf16 %v2855_v16, %v2855_v16  ;;  %v2906_v18 = vld [vmem:[#allocation2 + $0x1e8] sm:$0xff]  ;;  %v2910_v31 = vld [vmem:[#allocation2 + $0x1f8] sm:$0xff]  ;;  %v1817_v47 = vpack.c.bf16 %v2867_v19, %v2867_v19 }
 0x139   :  { %v1363_v20 = vadd.f32 %v1362_v59, %v1361_v1  ;;  %1268 = vst.msk [vmem:[%s3095_s2 + $0xc4] sm:$0xf] %vm1218_vm2, %v1813_v17  ;;  %v1818_v34 = vpack.c.bf16 %v2869_v35, %v2869_v35  ;;  %v1460_v46 = vmul.f32 %v2790_v39, %v2790_v39  ;;  %v1819_v22 = vpack.c.bf16 %v2879_v24, %v2879_v24 }
 0x13a   :  { %v1558_v28 = vadd.f32 %v1557_v6, %v1556_v38  ;;  %1271 = vst.msk [vmem:[%s3095_s2 + $0xd0] sm:$0xf] %vm1218_vm2, %v1816_v29  ;;  %v1820_v9 = vpack.c.bf16 %v2881_v33, %v2881_v33  ;;  %v1821_v2 = vpack.c.bf16 %v2883_v50, %v2883_v50  ;;  %v1822_v11 = vpack.c.bf16 %v2896_v21, %v2896_v21 }
 0x13b   :  { %v1365_v49 = vadd.f32 %v1364_v8, %v1363_v20  ;;  %v1823_v39 = vpack.c.bf16 %v2898_v7, %v2898_v7  ;;  %1272 = vst.msk [vmem:[%s3095_s2 + $0xd4] sm:$0xf] %vm1218_vm2, %v1817_v47  ;;  %1273 = vst.msk [vmem:[%s3095_s2 + $0xd8] sm:$0xf] %vm1218_vm2, %v1818_v34  ;;  %v1824_v41 = vpack.c.bf16 %v2900_v44, %v2900_v44  ;;  %v1565_v61 = vsel %vm19_vm1, %v1459_v37, 0.0 }
 0x13c   :  { %v1560_v42 = vadd.f32 %v1559_v10, %v1558_v28  ;;  %v1825_v52 = vpack.c.bf16 %v2906_v18, %v2906_v18  ;;  %v1826_v56 = vpack.c.bf16 %v2908_v13, %v2908_v13  ;;  %v1827_v55 = vpack.c.bf16 %v2910_v31, %v2910_v31  ;;  %1274 = vst.msk [vmem:[%s3095_s2 + $0xdc] sm:$0xf] %vm1218_vm2, %v1819_v22 }
 0x13d   :  { %v1367_v32 = vadd.f32 %v1366_v45, %v1365_v49  ;;  %1275 = vst.msk [vmem:[%s3095_s2 + $0xe0] sm:$0xf] %vm1218_vm2, %v1820_v9  ;;  %1276 = vst.msk [vmem:[%s3095_s2 + $0xe4] sm:$0xf] %vm1218_vm2, %v1821_v2  ;;  %v1567_v62 = vsel %vm19_vm1, %v1460_v46, 0.0  ;;  %v1461_v0 = vmul.f32 %v2794_v36, %v2794_v36  ;;  %v1462_v5 = vmul.f32 %v2782_v25, %v2782_v25 }
 0x13e   :  { %v1562_v40 = vadd.f32 %v1561_v51, %v1560_v42  ;;  %1277 = vst.msk [vmem:[%s3095_s2 + $0xe8] sm:$0xf] %vm1218_vm2, %v1822_v11  ;;  %1278 = vst.msk [vmem:[%s3095_s2 + $0xec] sm:$0xf] %vm1218_vm2, %v1823_v39  ;;  %v1372_v23 = vsel %vm19_vm1, %v2794_v36, 0.0  ;;  %v1374_v53 = vsel %vm19_vm1, %v2782_v25, 0.0  ;;  %v1463_v54 = vmul.f32 %v2792_v48, %v2792_v48 }
 0x13f   :  { %v1369_v58 = vadd.f32 %v1368_v14, %v1367_v32  ;;  %1279 = vst.msk [vmem:[%s3095_s2 + $0xf0] sm:$0xf] %vm1218_vm2, %v1824_v41  ;;  %1280 = vst.msk [vmem:[%s3095_s2 + $0xf4] sm:$0xf] %vm1218_vm2, %v1825_v52  ;;  %v1569_v38 = vsel %vm19_vm1, %v1461_v0, 0.0  ;;  %v1464_v45 = vmul.f32 %v2827_v3, %v2827_v3  ;;  %v1376_v36 = vsel %vm19_vm1, %v2792_v48, 0.0 }
 0x140   :  { %v1564_v15 = vadd.f32 %v1563_v43, %v1562_v40  ;;  %1281 = vst.msk [vmem:[%s3095_s2 + $0xf8] sm:$0xf] %vm1218_vm2, %v1826_v56  ;;  %1282 = vst.msk [vmem:[%s3095_s2 + $0xfc] sm:$0xf] %vm1218_vm2, %v1827_v55  ;;  %v1571_v43 = vsel %vm19_vm1, %v1462_v5, 0.0  ;;  %v1378_v10 = vsel %vm19_vm1, %v2827_v3, 0.0  ;;  %v1465_v28 = vmul.f32 %v2849_v30, %v2849_v30 }
 0x141   :  { %v1371_v4 = vadd.f32 %v1370_v60, %v1369_v58  ;;  %v1573_v27 = vsel %vm19_vm1, %v1463_v54, 0.0  ;;  %v1575_v20 = vsel %vm19_vm1, %v1464_v45, 0.0  ;;  %v1466_v8 = vmul.f32 %v2814_v57, %v2814_v57  ;;  %s1989_s2 = smov [#allocation3]  }
 0x142   :  { %v1566_v26 = vadd.f32 %v1565_v61, %v1564_v15  ;;  %v1380_v48 = vsel %vm19_vm1, %v2849_v30, 0.0  ;;  %v1382_v3 = vsel %vm19_vm1, %v2814_v57, 0.0  ;;  %v1467_v29 = vmul.f32 %v2836_v12, %v2836_v12  ;;  %s1625_s5 = sshll.u32 %s1989_s2, 4  ;;  %s1626_s5 = int_to_ptr.vmem [resolvable:$true] %s1625_s5 }
 0x143   :  { %v1373_v59 = vadd.f32 %v1372_v23, %v1371_v4  ;;  %v1577_v42 = vsel %vm19_vm1, %v1465_v28, 0.0  ;;  %v1468_v49 = vmul.f32 %v2855_v16, %v2855_v16  ;;  %v1384_v46 = vsel %vm19_vm1, %v2836_v12, 0.0  ;;  %s1964_s6 = scalar_lea.vmem %s1626_s5, 32  ;;  %p1969_p1 = scmp.lt.s32.totalorder %s1626_s5, %s1626_s5 }
 0x144   :  { %v1568_v6 = vadd.f32 %v1567_v62, %v1566_v26  ;;  %v1386_v30 = vsel %vm19_vm1, %v2855_v16, 0.0  ;;  %v1579_v22 = vsel %vm19_vm1, %v1466_v8, 0.0  ;;  %v1469_v2 = vmul.f32 %v2867_v19, %v2867_v19  ;;  %p1965_p0 = scmp.ne.s32.totalorder %s1626_s5, %s1964_s6  ;;  %p1970_p2 = scmp.lt.s32.totalorder %s1964_s6, %s1964_s6 }
 0x145   :  { %v1375_v1 = vadd.f32 %v1374_v53, %v1373_v59  ;;  %v1581_v32 = vsel %vm19_vm1, %v1467_v29, 0.0  ;;  %v1583_v40 = vsel %vm19_vm1, %v1468_v49, 0.0  ;;  %v1388_v41 = vsel %vm19_vm1, %v2867_v19, 0.0 }
 0x146   :  { %v1570_v63 = vadd.f32 %v1569_v38, %v1568_v6  ;;  %v1470_v12 = vmul.f32 %v2869_v35, %v2869_v35  ;;  %v1390_v56 = vsel %vm19_vm1, %v2869_v35, 0.0  ;;  %v1471_v55 = vmul.f32 %v2879_v24, %v2879_v24  ;;  %p1971_p3 = por %p1970_p2, %p1969_p1 }
 0x147   :  { %v1377_v25 = vadd.f32 %v1376_v36, %v1375_v1  ;;  %v1472_v15 = vmul.f32 %v2881_v33, %v2881_v33  ;;  %v1585_v58 = vsel %vm19_vm1, %v1469_v2, 0.0  ;;  %v1392_v19 = vsel %vm19_vm1, %v2879_v24, 0.0 }
 0x148   :  { %v1572_v14 = vadd.f32 %v1571_v43, %v1570_v63  ;;  %v1394_v0 = vsel %vm19_vm1, %v2881_v33, 0.0  ;;  %v1587_v4 = vsel %vm19_vm1, %v1470_v12, 0.0  ;;  %v1473_v5 = vmul.f32 %v2883_v50, %v2883_v50  ;;  %p1972_p4 = pnand %p1971_p3, %p1965_p0 }
 0x149   :  { %v1379_v37 = vadd.f32 %v1378_v10, %v1377_v25  ;;  %v1589_v23 = vsel %vm19_vm1, %v1471_v55, 0.0  ;;  %v1591_v6 = vsel %vm19_vm1, %v1472_v15, 0.0  ;;  %v1396_v54 = vsel %vm19_vm1, %v2883_v50, 0.0 }
 0x14a   :  { %v1574_v17 = vadd.f32 %v1573_v27, %v1572_v14  ;;  %v1474_v24 = vmul.f32 %v2896_v21, %v2896_v21  ;;  %v1398_v45 = vsel %vm19_vm1, %v2896_v21, 0.0  ;;  %v1475_v1 = vmul.f32 %v2898_v7, %v2898_v7 }
 0x14b   :  { %v1381_v60 = vadd.f32 %v1380_v48, %v1379_v37  ;;  %v1476_v63 = vmul.f32 %v2900_v44, %v2900_v44  ;;  %v1593_v43 = vsel %vm19_vm1, %v1473_v5, 0.0  ;;  %v1400_v50 = vsel %vm19_vm1, %v2898_v7, 0.0 }
 0x14c   :  { %v1576_v51 = vadd.f32 %v1575_v20, %v1574_v17  ;;  %v1402_v14 = vsel %vm19_vm1, %v2900_v44, 0.0  ;;  %v1595_v25 = vsel %vm19_vm1, %v1474_v24, 0.0  ;;  %v1477_v20 = vmul.f32 %v2906_v18, %v2906_v18 }
 0x14d   :  { %v1383_v47 = vadd.f32 %v1382_v3, %v1381_v60  ;;  %v1597_v28 = vsel %vm19_vm1, %v1475_v1, 0.0  ;;  %v1599_v37 = vsel %vm19_vm1, %v1476_v63, 0.0  ;;  %v1404_v48 = vsel %vm19_vm1, %v2906_v18, 0.0 }
 0x14e   :  { %v1578_v34 = vadd.f32 %v1577_v42, %v1576_v51  ;;  %v1478_v7 = vmul.f32 %v2908_v13, %v2908_v13  ;;  %v1406_v60 = vsel %vm19_vm1, %v2908_v13, 0.0  ;;  %v1479_v3 = vmul.f32 %v2910_v31, %v2910_v31 }
 0x14f   :  { %v1385_v9 = vadd.f32 %v1384_v46, %v1383_v47  ;;  %v1601_v29 = vsel %vm19_vm1, %v1477_v20, 0.0  ;;  %v1408_v47 = vsel %vm19_vm1, %v2910_v31, 0.0 }
 0x150   :  { %v1580_v57 = vadd.f32 %v1579_v22, %v1578_v34  ;;  %v1603_v18 = vsel %vm19_vm1, %v1478_v7, 0.0 }
 0x151   :  { %v1387_v11 = vadd.f32 %v1386_v30, %v1385_v9  ;;  %v1605_v30 = vsel %vm19_vm1, %v1479_v3, 0.0 }
 0x152   :  { %v1582_v39 = vadd.f32 %v1581_v32, %v1580_v57 }
 0x153   :  { %v1389_v16 = vadd.f32 %v1388_v41, %v1387_v11 }
 0x154   :  { %v1584_v52 = vadd.f32 %v1583_v40, %v1582_v39 }
 0x155   :  { %v1391_v61 = vadd.f32 %v1390_v56, %v1389_v16 }
 0x156   :  { %v1586_v62 = vadd.f32 %v1585_v58, %v1584_v52 }
 0x157   :  { %v1393_v26 = vadd.f32 %v1392_v19, %v1391_v61 }
 0x158   :  { %v1588_v35 = vadd.f32 %v1587_v4, %v1586_v62 }
 0x159   :  { %v1395_v59 = vadd.f32 %v1394_v0, %v1393_v26 }
 0x15a   :  { %v1590_v53 = vadd.f32 %v1589_v23, %v1588_v35 }
 0x15b   :  { %v1397_v33 = vadd.f32 %v1396_v54, %v1395_v59 }
 0x15c   :  { %v1592_v38 = vadd.f32 %v1591_v6, %v1590_v53 }
 0x15d   :  { %v1399_v36 = vadd.f32 %v1398_v45, %v1397_v33 }
 0x15e   :  { %v1594_v10 = vadd.f32 %v1593_v43, %v1592_v38 }
 0x15f   :  { %v1401_v27 = vadd.f32 %v1400_v50, %v1399_v36 }
 0x160   :  { %v1596_v21 = vadd.f32 %v1595_v25, %v1594_v10 }
 0x161   :  { %v1403_v17 = vadd.f32 %v1402_v14, %v1401_v27 }
 0x162   :  { %v1598_v8 = vadd.f32 %v1597_v28, %v1596_v21 }
 0x163   :  { %v1405_v44 = vadd.f32 %v1404_v48, %v1403_v17 }
 0x164   :  { %v1600_v51 = vadd.f32 %v1599_v37, %v1598_v8 }
 0x165   :  { %v1407_v42 = vadd.f32 %v1406_v60, %v1405_v44 }
 0x166   :  { %v1602_v49 = vadd.f32 %v1601_v29, %v1600_v51 }
 0x167   :  { %v1409_v34 = vadd.f32 %v1408_v47, %v1407_v42 }
 0x168   :  { %v1604_v46 = vadd.f32 %v1603_v18, %v1602_v49 }
 0x169   :  { %v1410_v22 = vrot.slane %v1409_v34, 4 }
 0x16a   :  { %v1606_v9 = vadd.f32 %v1605_v30, %v1604_v46 }
 0x16b   :  { %v1411_v57 = vadd.f32 %v1410_v22, %v1409_v34 }
 0x16c   :  { %v1607_v13 = vrot.slane %v1606_v9, 4 }
 0x16d   :  { %v1412_v2 = vrot.slane %v1411_v57, 2 }
 0x16e   :  { %v1608_v32 = vadd.f32 %v1607_v13, %v1606_v9 }
 0x16f   :  { %v1413_v40 = vadd.f32 %v1412_v2, %v1411_v57 }
 0x170   :  { %v1609_v11 = vrot.slane %v1608_v32, 2 }
 0x171   :  { %v1414_v39 = vrot.slane %v1413_v40, 1 }
 0x172   :  { %v1610_v41 = vadd.f32 %v1609_v11, %v1608_v32 }
 0x173   :  { %v1415_v31 = vadd.f32 %v1414_v39, %v1413_v40 }
 0x174   :  { %v1611_v12 = vrot.slane %v1610_v41, 1 }
 0x176   :  { %v1612_v16 = vadd.f32 %v1611_v12, %v1610_v41 }
 0x178   :  { %v1614_v52 = vsel %vm1613_vm3, %v1415_v31, %v1612_v16 }
 0x179   :  { %1616 = vst.msk [vmem:[#allocation3] sm:$0x3] %vm1615_vm4, %v1614_v52 }
 0x17a   :  { %1975 = shalt.err (!%p1972_p4)
}
 0x17b   :  { %s1976_s9 = scalar_lea.hbm %s3096_s3, 32 }
 0x17c   :  { %p1977_p5 = scmp.ne.s32.totalorder %s3096_s3, %s1976_s9  ;;  %p1980_p6 = scmp.lt.u32.totalorder %s1976_s9, %s3096_s3 }
 0x17e   :  { %p1982_p7 = pnand %p1980_p6, %p1977_p5 }
 0x180   :  { %1985 = shalt.err (!%p1982_p7)
}
 0x181   :  { %1628 = dma.vmem_to_hbm [thread:$0]  %s1626_s5, 32, %s3096_s3, [#allocation4]  }
 0x182   :  { %1986 = dma.done.wait [#allocation4], 32  }
 0x183   :  { %1987 = vsyncadd [#allocation4], 4294967264 }
 0x184   :  { %1634 = vsyncpa [#allocation4], 1 }

</bundles_post_ra>
